<compile_context>
chip_gen: v7x
topology: tpu7x:2x2x1
jax: 0.10.0
libtpu: 0.0.40
codegen_flags: <defaults>
</compile_context>

<pallas_src>
import numpy as np
import jax
import jax.numpy as jnp
from jax import lax
from jax.experimental import pallas as pl
from jax.experimental.pallas import tpu as pltpu

# ----- model hyper-parameters (small, consistent with the module's __init__) -----
INPUT_DIM = 16          # per-timestep feature dim fed to the LSTM
SELF_STATE_DIM = 6      # first 6 features of timestep 0 are the "self state"
LSTM_HIDDEN = 32        # lstm_hidden_dim
MLP_DIMS = [32, 32, 1]  # mlp_dims (last layer has no ReLU)


def value_network_kernel(x_ref,                        # (B_TILE, T*D) input slab (row-major per batch row)
                         wblk_ref,                     # (T, T*D, 4H) block-expanded input weights
                         bg_ref, whh_ref,              # (1,4H), (H,4H)
                         w0s_ref, w0h_ref, b0_ref,     # (S,d0), (H,d0), (1,d0)
                         w1_ref, b1_ref,               # (d0,d1), (1,d1)
                         w2_ref, b2_ref,               # (1,d1), (1,1)
                         out_ref,                      # (B_TILE, 1)
                         xg_ref):                      # scratch (T, B_TILE, 4H) f32
    B = x_ref.shape[0]
    H = whh_ref.shape[0]
    T = wblk_ref.shape[0]

    whh = whh_ref[...]                                 # (H, 4H) resident, 4 vregs
    bg = bg_ref[...]                                   # (1, 4H)

    # ---- hoisted input projection, off the serial chain: one (B, T*D) @ (T*D, 4H) matmul per t,
    #      stored straight into VMEM scratch so nothing stays live across the recurrence ----
    for t in range(T):
        xg_ref[t] = (jnp.dot(x_ref[...], wblk_ref[t],
                             preferred_element_type=jnp.float32) + bg)

    # ---- gate-activation constants, hoisted once (sigmoid(x) = 0.5*tanh(0.5*x) + 0.5;
    #      the g-gate lanes keep plain tanh) ----
    lane = lax.broadcasted_iota(jnp.int32, (B, 4 * H), 1)
    is_g = (lane >= 2 * H) & (lane < 3 * H)
    gmul = jnp.where(is_g, 1.0, 0.5).astype(jnp.float32)   # pre-scale AND post-scale
    gadd = jnp.where(is_g, 0.0, 0.5).astype(jnp.float32)   # post-offset for sigmoid lanes

    # ---- recurrence: only h @ W_hh + elementwise sit on the serial chain ----
    def step(t, carry):
        h, c = carry
        pre = xg_ref[t] + jnp.dot(h, whh, preferred_element_type=jnp.float32)  # (B, 4H)
        th = jnp.tanh(pre * gmul)                      # one full-vreg EUP pass for all 4 gates
        act = th * gmul + gadd                         # sigmoid for i/f/o lanes, tanh for g lanes
        i_g = act[:, 0 * H:1 * H]
        f_g = act[:, 1 * H:2 * H]
        g_g = act[:, 2 * H:3 * H]
        o_g = act[:, 3 * H:4 * H]
        c = f_g * c + i_g * g_g
        h = o_g * jnp.tanh(c)
        return h, c

    h0 = jnp.zeros((B, H), jnp.float32)
    c0 = jnp.zeros((B, H), jnp.float32)
    h, _ = lax.fori_loop(0, T, step, (h0, c0), unroll=True)

    # self_state = state[:, 0, :S]  ==  first S lanes of the row-major (T*D) slab
    self_state = x_ref[:, :SELF_STATE_DIM].astype(jnp.float32)    # (B, S)

    # MLP layer 0 on the (implicit) concat [self_state, hn]:
    #   concat([s, h]) @ W0  ==  s @ W0[:S] + h @ W0[S:]
    z = (jnp.dot(self_state, w0s_ref[...], preferred_element_type=jnp.float32)
         + jnp.dot(h, w0h_ref[...], preferred_element_type=jnp.float32)
         + b0_ref[...])
    z = jnp.maximum(z, 0.0)

    z = jnp.dot(z, w1_ref[...], preferred_element_type=jnp.float32) + b1_ref[...]
    z = jnp.maximum(z, 0.0)

    # final (d1 -> 1) layer as multiply + lane reduce; tiny (b_tile, 1) writeback
    v = jnp.sum(z * w2_ref[...], axis=1, keepdims=True) + b2_ref[...]
    out_ref[...] = v


def _round_up(x, m):
    return (x + m - 1) // m * m


def value_network1(state, params, *, b_tile_max=512):
    """state: (B, T, INPUT_DIM) -> value: (B, 1) float32."""
    B, T, D = state.shape
    S = SELF_STATE_DIM
    H = LSTM_HIDDEN
    d0, d1, d2 = MLP_DIMS

    # free row-major reshape: each batch row is a lane-dense T*D (=128) slab; NO transpose.
    x2d = state.reshape(B, T * D)
    dtype = x2d.dtype                                   # pass bf16 state to halve input DMA

    # block-expanded input weights: x2d @ wblk[t] == state[:, t, :] @ W_ih^T
    w_ih_t = params["w_ih_t"].astype(dtype)             # (D, 4H)
    wblk = jnp.zeros((T, T * D, 4 * H), dtype)
    for t in range(T):
        wblk = wblk.at[t, t * D:(t + 1) * D, :].set(w_ih_t)

    # ---- batch tile selection ----
    # small B: one tile.  large B: biggest tile up to b_tile_max, but keep >= 2 grid steps so the
    # ("parallel",) batch axis shards across both TensorCores on v7x.  b_tile=512 keeps the
    # (T, b_tile, 4H) scratch (~2 MiB) well inside even v5e's 16 MiB default scoped VMEM.
    B8 = _round_up(B, 8)
    if B8 <= 128:
        b_tile, B_pad = B8, B8
    else:
        b_tile = min(b_tile_max, _round_up(-(-B8 // 2), 8))
        B_pad = _round_up(B8, b_tile)
    if B_pad != B:
        x2d = jnp.pad(x2d, ((0, B_pad - B), (0, 0)))

    mw0 = params["mw0"]                                  # (S+H, d0)
    inputs = [
        x2d, wblk,
        params["b_gates"], params["w_hh_t"],
        mw0[:S, :], mw0[S:, :], params["mb0"],
        params["mw1"], params["mb1"],
        jnp.reshape(params["mw2"], (1, d1)),             # (d1, 1) -> (1, d1) row
        params["mb2"],                                   # (1, 1)
    ]

    def const_spec(a):
        # full array, constant block index -> stays resident in VMEM across the batch grid
        nd = a.ndim
        return pl.BlockSpec(a.shape, lambda i, nd=nd: (0,) * nd)

    grid = (B_pad // b_tile,)
    out = pl.pallas_call(
        value_network_kernel,
        out_shape=jax.ShapeDtypeStruct((B_pad, 1), jnp.float32),
        grid=grid,
        in_specs=[pl.BlockSpec((b_tile, T * D), lambda i: (i, 0))]
                 + [const_spec(a) for a in inputs[1:]],
        out_specs=pl.BlockSpec((b_tile, 1), lambda i: (i, 0)),
        scratch_shapes=[pltpu.VMEM((T, b_tile, 4 * H), jnp.float32)],
        compiler_params=pltpu.CompilerParams(
            dimension_semantics=("parallel",)),
    )(*inputs)
    return out[:B, :]


def init_params(key):
    """Deterministic PyTorch-shaped parameters (uniform(-1/sqrt(fan), 1/sqrt(fan)))."""
    H, D, S = LSTM_HIDDEN, INPUT_DIM, SELF_STATE_DIM
    keys = jax.random.split(key, 16)

    def unif(k, shape, fan):
        b = 1.0 / np.sqrt(fan)
        return jax.random.uniform(k, shape, jnp.float32, -b, b)

    # nn.LSTM(input_dim, H): weight_ih (4H, D), weight_hh (4H, H), biases (4H,)
    w_ih = unif(keys[0], (4 * H, D), H)
    w_hh = unif(keys[1], (4 * H, H), H)
    b_ih = unif(keys[2], (4 * H,), H)
    b_hh = unif(keys[3], (4 * H,), H)

    dims = [S + H] + MLP_DIMS
    mws, mbs = [], []
    for li in range(len(MLP_DIMS)):
        mws.append(unif(keys[4 + 2 * li], (dims[li + 1], dims[li]), dims[li]))
        mbs.append(unif(keys[5 + 2 * li], (dims[li + 1],), dims[li]))

    return {
        "w_ih_t": jnp.transpose(w_ih),                 # (D, 4H)
        "w_hh_t": jnp.transpose(w_hh),                 # (H, 4H)
        "b_gates": (b_ih + b_hh)[None, :],             # (1, 4H)
        "mw0": jnp.transpose(mws[0]),                  # (S+H, d0)
        "mb0": mbs[0][None, :],
        "mw1": jnp.transpose(mws[1]),                  # (d0, d1)
        "mb1": mbs[1][None, :],
        "mw2": jnp.transpose(mws[2]),                  # (d1, d2)
        "mb2": mbs[2][None, :],
    }


def reference(state, params):
    """Pure-JAX replica of ValueNetwork1.forward (HIGHEST precision) for verification."""
    B, T, D = state.shape
    H = LSTM_HIDDEN
    h = jnp.zeros((B, H), jnp.float32)
    c = jnp.zeros((B, H), jnp.float32)
    hp = lax.Precision.HIGHEST
    for t in range(T):
        g = (jnp.dot(state[:, t, :], params["w_ih_t"], precision=hp)
             + jnp.dot(h, params["w_hh_t"], precision=hp)
             + params["b_gates"])
        i = jax.nn.sigmoid(g[:, 0 * H:1 * H])
        f = jax.nn.sigmoid(g[:, 1 * H:2 * H])
        gg = jnp.tanh(g[:, 2 * H:3 * H])
        o = jax.nn.sigmoid(g[:, 3 * H:4 * H])
        c = f * c + i * gg
        h = o * jnp.tanh(c)
    self_state = state[:, 0, :SELF_STATE_DIM]
    joint = jnp.concatenate([self_state, h], axis=1)
    z = jax.nn.relu(jnp.dot(joint, params["mw0"], precision=hp) + params["mb0"])
    z = jax.nn.relu(jnp.dot(z, params["mw1"], precision=hp) + params["mb1"])
    return jnp.dot(z, params["mw2"], precision=hp) + params["mb2"]


if __name__ == "__main__":
    key = jax.random.PRNGKey(0)
    pkey, xkey = jax.random.split(key)

    params = init_params(pkey)

    B, T = 2, 8
    state = jax.random.normal(xkey, (B, T, INPUT_DIM), dtype=jnp.float32)

    value = value_network1(state, params)
    value = jax.block_until_ready(value)

    ref = reference(state, params)
    np.testing.assert_allclose(np.asarray(value), np.asarray(ref),
                               rtol=2e-2, atol=2e-2)
    assert value.shape == (B, 1)
    print("KERNEL_OK")
</pallas_src>

<mosaic_0001>
module attributes {stable_mosaic.version = 11 : i64} {
  func.func @value_network_kernel(%arg0: i32, %arg1: memref<8x128xf32, #tpu.memory_space<vmem>>, %arg2: memref<8x128x128xf32, #tpu.memory_space<vmem>>, %arg3: memref<1x128xf32, #tpu.memory_space<vmem>>, %arg4: memref<32x128xf32, #tpu.memory_space<vmem>>, %arg5: memref<6x32xf32, #tpu.memory_space<vmem>>, %arg6: memref<32x32xf32, #tpu.memory_space<vmem>>, %arg7: memref<1x32xf32, #tpu.memory_space<vmem>>, %arg8: memref<32x32xf32, #tpu.memory_space<vmem>>, %arg9: memref<1x32xf32, #tpu.memory_space<vmem>>, %arg10: memref<1x32xf32, #tpu.memory_space<vmem>>, %arg11: memref<1x1xf32, #tpu.memory_space<vmem>>, %arg12: memref<8x1xf32, #tpu.memory_space<vmem>>, %arg13: memref<8x8x128xf32, #tpu.memory_space<vmem>>) attributes {dimension_semantics = [#tpu.dimension_semantics<parallel>], iteration_bounds = array<i64: 1>, scalar_prefetch = 0 : i64, scratch_operands = 1 : i64, tpu.core_type = #tpu.core_type<tc>, window_params = [{transform_indices = @transform_0, window_bounds = array<i64: 8, 128>}, {pipeline_mode = #tpu.pipeline_mode<synchronous>, transform_indices = @transform_1, window_bounds = array<i64: 8, 128, 128>}, {pipeline_mode = #tpu.pipeline_mode<synchronous>, transform_indices = @transform_2, window_bounds = array<i64: 1, 128>}, {pipeline_mode = #tpu.pipeline_mode<synchronous>, transform_indices = @transform_3, window_bounds = array<i64: 32, 128>}, {pipeline_mode = #tpu.pipeline_mode<synchronous>, transform_indices = @transform_4, window_bounds = array<i64: 6, 32>}, {pipeline_mode = #tpu.pipeline_mode<synchronous>, transform_indices = @transform_5, window_bounds = array<i64: 32, 32>}, {pipeline_mode = #tpu.pipeline_mode<synchronous>, transform_indices = @transform_6, window_bounds = array<i64: 1, 32>}, {pipeline_mode = #tpu.pipeline_mode<synchronous>, transform_indices = @transform_7, window_bounds = array<i64: 32, 32>}, {pipeline_mode = #tpu.pipeline_mode<synchronous>, transform_indices = @transform_8, window_bounds = array<i64: 1, 32>}, {pipeline_mode = #tpu.pipeline_mode<synchronous>, transform_indices = @transform_9, window_bounds = array<i64: 1, 32>}, {pipeline_mode = #tpu.pipeline_mode<synchronous>, transform_indices = @transform_10, window_bounds = array<i64: 1, 1>}, {transform_indices = @transform_11, window_bounds = array<i64: 8, 1>}]} {
    %c0 = arith.constant 0 : index
    %c0_0 = arith.constant 0 : index
    %0 = vector.load %arg4[%c0, %c0_0] : memref<32x128xf32, #tpu.memory_space<vmem>>, vector<32x128xf32>
    %c0_1 = arith.constant 0 : index
    %c0_2 = arith.constant 0 : index
    %1 = vector.load %arg3[%c0_1, %c0_2] : memref<1x128xf32, #tpu.memory_space<vmem>>, vector<1x128xf32>
    %c0_3 = arith.constant 0 : index
    %c0_4 = arith.constant 0 : index
    %2 = vector.load %arg1[%c0_3, %c0_4] : memref<8x128xf32, #tpu.memory_space<vmem>>, vector<8x128xf32>
    %c0_5 = arith.constant 0 : index
    %c0_6 = arith.constant 0 : index
    %c0_7 = arith.constant 0 : index
    %3 = vector.load %arg2[%c0_5, %c0_6, %c0_7] : memref<8x128x128xf32, #tpu.memory_space<vmem>>, vector<1x128x128xf32>
    %4 = vector.shape_cast %3 : vector<1x128x128xf32> to vector<128x128xf32>
    %cst = arith.constant dense<0.000000e+00> : vector<8x128xf32>
    %5 = tpu.matmul %2, %4, %cst {dimension_numbers = #tpu.dot_dimension_numbers<[1], [0], [0], [1], [0, 0, 1, 1], [], []>} : vector<8x128xf32>, vector<128x128xf32>, vector<8x128xf32> -> vector<8x128xf32>
    %6 = vector.broadcast %1 : vector<1x128xf32> to vector<8x128xf32>
    %7 = arith.addf %5, %6 : vector<8x128xf32>
    %c0_8 = arith.constant 0 : index
    %c0_9 = arith.constant 0 : index
    %c0_10 = arith.constant 0 : index
    %8 = vector.load %arg13[%c0_8, %c0_9, %c0_10] : memref<8x8x128xf32, #tpu.memory_space<vmem>>, vector<1x8x128xf32>
    %9 = vector.shape_cast %8 : vector<1x8x128xf32> to vector<8x128xf32>
    %10 = vector.shape_cast %7 : vector<8x128xf32> to vector<1x8x128xf32>
    tpu.vector_store %arg13[%c0_8, %c0_9, %c0_10], %10 {strides = array<i32>} : memref<8x8x128xf32, #tpu.memory_space<vmem>>, vector<1x8x128xf32>,
    %c0_11 = arith.constant 0 : index
    %c0_12 = arith.constant 0 : index
    %11 = vector.load %arg1[%c0_11, %c0_12] : memref<8x128xf32, #tpu.memory_space<vmem>>, vector<8x128xf32>
    %c1 = arith.constant 1 : index
    %c0_13 = arith.constant 0 : index
    %c0_14 = arith.constant 0 : index
    %12 = vector.load %arg2[%c1, %c0_13, %c0_14] : memref<8x128x128xf32, #tpu.memory_space<vmem>>, vector<1x128x128xf32>
    %13 = vector.shape_cast %12 : vector<1x128x128xf32> to vector<128x128xf32>
    %cst_15 = arith.constant dense<0.000000e+00> : vector<8x128xf32>
    %14 = tpu.matmul %11, %13, %cst_15 {dimension_numbers = #tpu.dot_dimension_numbers<[1], [0], [0], [1], [0, 0, 1, 1], [], []>} : vector<8x128xf32>, vector<128x128xf32>, vector<8x128xf32> -> vector<8x128xf32>
    %15 = vector.broadcast %1 : vector<1x128xf32> to vector<8x128xf32>
    %16 = arith.addf %14, %15 : vector<8x128xf32>
    %c1_16 = arith.constant 1 : index
    %c0_17 = arith.constant 0 : index
    %c0_18 = arith.constant 0 : index
    %17 = vector.load %arg13[%c1_16, %c0_17, %c0_18] : memref<8x8x128xf32, #tpu.memory_space<vmem>>, vector<1x8x128xf32>
    %18 = vector.shape_cast %17 : vector<1x8x128xf32> to vector<8x128xf32>
    %19 = vector.shape_cast %16 : vector<8x128xf32> to vector<1x8x128xf32>
    tpu.vector_store %arg13[%c1_16, %c0_17, %c0_18], %19 {strides = array<i32>} : memref<8x8x128xf32, #tpu.memory_space<vmem>>, vector<1x8x128xf32>,
    %c0_19 = arith.constant 0 : index
    %c0_20 = arith.constant 0 : index
    %20 = vector.load %arg1[%c0_19, %c0_20] : memref<8x128xf32, #tpu.memory_space<vmem>>, vector<8x128xf32>
    %c2 = arith.constant 2 : index
    %c0_21 = arith.constant 0 : index
    %c0_22 = arith.constant 0 : index
    %21 = vector.load %arg2[%c2, %c0_21, %c0_22] : memref<8x128x128xf32, #tpu.memory_space<vmem>>, vector<1x128x128xf32>
    %22 = vector.shape_cast %21 : vector<1x128x128xf32> to vector<128x128xf32>
    %cst_23 = arith.constant dense<0.000000e+00> : vector<8x128xf32>
    %23 = tpu.matmul %20, %22, %cst_23 {dimension_numbers = #tpu.dot_dimension_numbers<[1], [0], [0], [1], [0, 0, 1, 1], [], []>} : vector<8x128xf32>, vector<128x128xf32>, vector<8x128xf32> -> vector<8x128xf32>
    %24 = vector.broadcast %1 : vector<1x128xf32> to vector<8x128xf32>
    %25 = arith.addf %23, %24 : vector<8x128xf32>
    %c2_24 = arith.constant 2 : index
    %c0_25 = arith.constant 0 : index
    %c0_26 = arith.constant 0 : index
    %26 = vector.load %arg13[%c2_24, %c0_25, %c0_26] : memref<8x8x128xf32, #tpu.memory_space<vmem>>, vector<1x8x128xf32>
    %27 = vector.shape_cast %26 : vector<1x8x128xf32> to vector<8x128xf32>
    %28 = vector.shape_cast %25 : vector<8x128xf32> to vector<1x8x128xf32>
    tpu.vector_store %arg13[%c2_24, %c0_25, %c0_26], %28 {strides = array<i32>} : memref<8x8x128xf32, #tpu.memory_space<vmem>>, vector<1x8x128xf32>,
    %c0_27 = arith.constant 0 : index
    %c0_28 = arith.constant 0 : index
    %29 = vector.load %arg1[%c0_27, %c0_28] : memref<8x128xf32, #tpu.memory_space<vmem>>, vector<8x128xf32>
    %c3 = arith.constant 3 : index
    %c0_29 = arith.constant 0 : index
    %c0_30 = arith.constant 0 : index
    %30 = vector.load %arg2[%c3, %c0_29, %c0_30] : memref<8x128x128xf32, #tpu.memory_space<vmem>>, vector<1x128x128xf32>
    %31 = vector.shape_cast %30 : vector<1x128x128xf32> to vector<128x128xf32>
    %cst_31 = arith.constant dense<0.000000e+00> : vector<8x128xf32>
    %32 = tpu.matmul %29, %31, %cst_31 {dimension_numbers = #tpu.dot_dimension_numbers<[1], [0], [0], [1], [0, 0, 1, 1], [], []>} : vector<8x128xf32>, vector<128x128xf32>, vector<8x128xf32> -> vector<8x128xf32>
    %33 = vector.broadcast %1 : vector<1x128xf32> to vector<8x128xf32>
    %34 = arith.addf %32, %33 : vector<8x128xf32>
    %c3_32 = arith.constant 3 : index
    %c0_33 = arith.constant 0 : index
    %c0_34 = arith.constant 0 : index
    %35 = vector.load %arg13[%c3_32, %c0_33, %c0_34] : memref<8x8x128xf32, #tpu.memory_space<vmem>>, vector<1x8x128xf32>
    %36 = vector.shape_cast %35 : vector<1x8x128xf32> to vector<8x128xf32>
    %37 = vector.shape_cast %34 : vector<8x128xf32> to vector<1x8x128xf32>
    tpu.vector_store %arg13[%c3_32, %c0_33, %c0_34], %37 {strides = array<i32>} : memref<8x8x128xf32, #tpu.memory_space<vmem>>, vector<1x8x128xf32>,
    %c0_35 = arith.constant 0 : index
    %c0_36 = arith.constant 0 : index
    %38 = vector.load %arg1[%c0_35, %c0_36] : memref<8x128xf32, #tpu.memory_space<vmem>>, vector<8x128xf32>
    %c4 = arith.constant 4 : index
    %c0_37 = arith.constant 0 : index
    %c0_38 = arith.constant 0 : index
    %39 = vector.load %arg2[%c4, %c0_37, %c0_38] : memref<8x128x128xf32, #tpu.memory_space<vmem>>, vector<1x128x128xf32>
    %40 = vector.shape_cast %39 : vector<1x128x128xf32> to vector<128x128xf32>
    %cst_39 = arith.constant dense<0.000000e+00> : vector<8x128xf32>
    %41 = tpu.matmul %38, %40, %cst_39 {dimension_numbers = #tpu.dot_dimension_numbers<[1], [0], [0], [1], [0, 0, 1, 1], [], []>} : vector<8x128xf32>, vector<128x128xf32>, vector<8x128xf32> -> vector<8x128xf32>
    %42 = vector.broadcast %1 : vector<1x128xf32> to vector<8x128xf32>
    %43 = arith.addf %41, %42 : vector<8x128xf32>
    %c4_40 = arith.constant 4 : index
    %c0_41 = arith.constant 0 : index
    %c0_42 = arith.constant 0 : index
    %44 = vector.load %arg13[%c4_40, %c0_41, %c0_42] : memref<8x8x128xf32, #tpu.memory_space<vmem>>, vector<1x8x128xf32>
    %45 = vector.shape_cast %44 : vector<1x8x128xf32> to vector<8x128xf32>
    %46 = vector.shape_cast %43 : vector<8x128xf32> to vector<1x8x128xf32>
    tpu.vector_store %arg13[%c4_40, %c0_41, %c0_42], %46 {strides = array<i32>} : memref<8x8x128xf32, #tpu.memory_space<vmem>>, vector<1x8x128xf32>,
    %c0_43 = arith.constant 0 : index
    %c0_44 = arith.constant 0 : index
    %47 = vector.load %arg1[%c0_43, %c0_44] : memref<8x128xf32, #tpu.memory_space<vmem>>, vector<8x128xf32>
    %c5 = arith.constant 5 : index
    %c0_45 = arith.constant 0 : index
    %c0_46 = arith.constant 0 : index
    %48 = vector.load %arg2[%c5, %c0_45, %c0_46] : memref<8x128x128xf32, #tpu.memory_space<vmem>>, vector<1x128x128xf32>
    %49 = vector.shape_cast %48 : vector<1x128x128xf32> to vector<128x128xf32>
    %cst_47 = arith.constant dense<0.000000e+00> : vector<8x128xf32>
    %50 = tpu.matmul %47, %49, %cst_47 {dimension_numbers = #tpu.dot_dimension_numbers<[1], [0], [0], [1], [0, 0, 1, 1], [], []>} : vector<8x128xf32>, vector<128x128xf32>, vector<8x128xf32> -> vector<8x128xf32>
    %51 = vector.broadcast %1 : vector<1x128xf32> to vector<8x128xf32>
    %52 = arith.addf %50, %51 : vector<8x128xf32>
    %c5_48 = arith.constant 5 : index
    %c0_49 = arith.constant 0 : index
    %c0_50 = arith.constant 0 : index
    %53 = vector.load %arg13[%c5_48, %c0_49, %c0_50] : memref<8x8x128xf32, #tpu.memory_space<vmem>>, vector<1x8x128xf32>
    %54 = vector.shape_cast %53 : vector<1x8x128xf32> to vector<8x128xf32>
    %55 = vector.shape_cast %52 : vector<8x128xf32> to vector<1x8x128xf32>
    tpu.vector_store %arg13[%c5_48, %c0_49, %c0_50], %55 {strides = array<i32>} : memref<8x8x128xf32, #tpu.memory_space<vmem>>, vector<1x8x128xf32>,
    %c0_51 = arith.constant 0 : index
    %c0_52 = arith.constant 0 : index
    %56 = vector.load %arg1[%c0_51, %c0_52] : memref<8x128xf32, #tpu.memory_space<vmem>>, vector<8x128xf32>
    %c6 = arith.constant 6 : index
    %c0_53 = arith.constant 0 : index
    %c0_54 = arith.constant 0 : index
    %57 = vector.load %arg2[%c6, %c0_53, %c0_54] : memref<8x128x128xf32, #tpu.memory_space<vmem>>, vector<1x128x128xf32>
    %58 = vector.shape_cast %57 : vector<1x128x128xf32> to vector<128x128xf32>
    %cst_55 = arith.constant dense<0.000000e+00> : vector<8x128xf32>
    %59 = tpu.matmul %56, %58, %cst_55 {dimension_numbers = #tpu.dot_dimension_numbers<[1], [0], [0], [1], [0, 0, 1, 1], [], []>} : vector<8x128xf32>, vector<128x128xf32>, vector<8x128xf32> -> vector<8x128xf32>
    %60 = vector.broadcast %1 : vector<1x128xf32> to vector<8x128xf32>
    %61 = arith.addf %59, %60 : vector<8x128xf32>
    %c6_56 = arith.constant 6 : index
    %c0_57 = arith.constant 0 : index
    %c0_58 = arith.constant 0 : index
    %62 = vector.load %arg13[%c6_56, %c0_57, %c0_58] : memref<8x8x128xf32, #tpu.memory_space<vmem>>, vector<1x8x128xf32>
    %63 = vector.shape_cast %62 : vector<1x8x128xf32> to vector<8x128xf32>
    %64 = vector.shape_cast %61 : vector<8x128xf32> to vector<1x8x128xf32>
    tpu.vector_store %arg13[%c6_56, %c0_57, %c0_58], %64 {strides = array<i32>} : memref<8x8x128xf32, #tpu.memory_space<vmem>>, vector<1x8x128xf32>,
    %c0_59 = arith.constant 0 : index
    %c0_60 = arith.constant 0 : index
    %65 = vector.load %arg1[%c0_59, %c0_60] : memref<8x128xf32, #tpu.memory_space<vmem>>, vector<8x128xf32>
    %c7 = arith.constant 7 : index
    %c0_61 = arith.constant 0 : index
    %c0_62 = arith.constant 0 : index
    %66 = vector.load %arg2[%c7, %c0_61, %c0_62] : memref<8x128x128xf32, #tpu.memory_space<vmem>>, vector<1x128x128xf32>
    %67 = vector.shape_cast %66 : vector<1x128x128xf32> to vector<128x128xf32>
    %cst_63 = arith.constant dense<0.000000e+00> : vector<8x128xf32>
    %68 = tpu.matmul %65, %67, %cst_63 {dimension_numbers = #tpu.dot_dimension_numbers<[1], [0], [0], [1], [0, 0, 1, 1], [], []>} : vector<8x128xf32>, vector<128x128xf32>, vector<8x128xf32> -> vector<8x128xf32>
    %69 = vector.broadcast %1 : vector<1x128xf32> to vector<8x128xf32>
    %70 = arith.addf %68, %69 : vector<8x128xf32>
    %c7_64 = arith.constant 7 : index
    %c0_65 = arith.constant 0 : index
    %c0_66 = arith.constant 0 : index
    %71 = vector.load %arg13[%c7_64, %c0_65, %c0_66] : memref<8x8x128xf32, #tpu.memory_space<vmem>>, vector<1x8x128xf32>
    %72 = vector.shape_cast %71 : vector<1x8x128xf32> to vector<8x128xf32>
    %73 = vector.shape_cast %70 : vector<8x128xf32> to vector<1x8x128xf32>
    tpu.vector_store %arg13[%c7_64, %c0_65, %c0_66], %73 {strides = array<i32>} : memref<8x8x128xf32, #tpu.memory_space<vmem>>, vector<1x8x128xf32>,
    %74 = tpu.iota {dimensions = array<i32: 1>} : vector<8x128xi32>
    %c64_i32 = arith.constant 64 : i32
    %75 = vector.broadcast %c64_i32 : i32 to vector<8x128xi32>
    %76 = arith.cmpi sge, %74, %75 : vector<8x128xi32>
    %c96_i32 = arith.constant 96 : i32
    %77 = vector.broadcast %c96_i32 : i32 to vector<8x128xi32>
    %78 = arith.cmpi slt, %74, %77 : vector<8x128xi32>
    %79 = arith.andi %76, %78 : vector<8x128xi1>
    %cst_67 = arith.constant 1.000000e+00 : f32
    %cst_68 = arith.constant 5.000000e-01 : f32
    %80 = vector.broadcast %cst_67 : f32 to vector<8x128xf32>
    %81 = vector.broadcast %cst_68 : f32 to vector<8x128xf32>
    %82 = arith.select %79, %80, %81 : vector<8x128xi1>, vector<8x128xf32>
    %cst_69 = arith.constant 0.000000e+00 : f32
    %cst_70 = arith.constant 5.000000e-01 : f32
    %83 = vector.broadcast %cst_69 : f32 to vector<8x128xf32>
    %84 = vector.broadcast %cst_70 : f32 to vector<8x128xf32>
    %85 = arith.select %79, %83, %84 : vector<8x128xi1>, vector<8x128xf32>
    %cst_71 = arith.constant 0.000000e+00 : f32
    %86 = vector.broadcast %cst_71 : f32 to vector<8x32xf32>
    %cst_72 = arith.constant 0.000000e+00 : f32
    %87 = vector.broadcast %cst_72 : f32 to vector<8x32xf32>
    %c0_i32 = arith.constant 0 : i32
    %88 = arith.index_cast %c0_i32 : i32 to index
    %c0_73 = arith.constant 0 : index
    %c0_74 = arith.constant 0 : index
    %89 = vector.load %arg13[%88, %c0_73, %c0_74] : memref<8x8x128xf32, #tpu.memory_space<vmem>>, vector<1x8x128xf32>
    %90 = vector.shape_cast %89 : vector<1x8x128xf32> to vector<8x128xf32>
    %cst_75 = arith.constant dense<0.000000e+00> : vector<8x128xf32>
    %91 = tpu.matmul %86, %0, %cst_75 {dimension_numbers = #tpu.dot_dimension_numbers<[1], [0], [0], [1], [0, 0, 1, 1], [], []>} : vector<8x32xf32>, vector<32x128xf32>, vector<8x128xf32> -> vector<8x128xf32>
    %92 = arith.addf %90, %91 : vector<8x128xf32>
    %93 = arith.mulf %92, %82 : vector<8x128xf32>
    %94 = math.tanh %93 : vector<8x128xf32>
    %95 = arith.mulf %94, %82 : vector<8x128xf32>
    %96 = arith.addf %95, %85 : vector<8x128xf32>
    %97 = vector.extract_strided_slice %96 {offsets = [0, 0], sizes = [8, 32], strides = [1, 1]} : vector<8x128xf32> to vector<8x32xf32>
    %98 = vector.extract_strided_slice %96 {offsets = [0, 32], sizes = [8, 32], strides = [1, 1]} : vector<8x128xf32> to vector<8x32xf32>
    %99 = vector.extract_strided_slice %96 {offsets = [0, 64], sizes = [8, 32], strides = [1, 1]} : vector<8x128xf32> to vector<8x32xf32>
    %100 = vector.extract_strided_slice %96 {offsets = [0, 96], sizes = [8, 32], strides = [1, 1]} : vector<8x128xf32> to vector<8x32xf32>
    %101 = arith.mulf %98, %87 : vector<8x32xf32>
    %102 = arith.mulf %97, %99 : vector<8x32xf32>
    %103 = arith.addf %101, %102 : vector<8x32xf32>
    %104 = math.tanh %103 : vector<8x32xf32>
    %105 = arith.mulf %100, %104 : vector<8x32xf32>
    %c1_i32 = arith.constant 1 : i32
    %106 = arith.index_cast %c1_i32 : i32 to index
    %c0_76 = arith.constant 0 : index
    %c0_77 = arith.constant 0 : index
    %107 = vector.load %arg13[%106, %c0_76, %c0_77] : memref<8x8x128xf32, #tpu.memory_space<vmem>>, vector<1x8x128xf32>
    %108 = vector.shape_cast %107 : vector<1x8x128xf32> to vector<8x128xf32>
    %cst_78 = arith.constant dense<0.000000e+00> : vector<8x128xf32>
    %109 = tpu.matmul %105, %0, %cst_78 {dimension_numbers = #tpu.dot_dimension_numbers<[1], [0], [0], [1], [0, 0, 1, 1], [], []>} : vector<8x32xf32>, vector<32x128xf32>, vector<8x128xf32> -> vector<8x128xf32>
    %110 = arith.addf %108, %109 : vector<8x128xf32>
    %111 = arith.mulf %110, %82 : vector<8x128xf32>
    %112 = math.tanh %111 : vector<8x128xf32>
    %113 = arith.mulf %112, %82 : vector<8x128xf32>
    %114 = arith.addf %113, %85 : vector<8x128xf32>
    %115 = vector.extract_strided_slice %114 {offsets = [0, 0], sizes = [8, 32], strides = [1, 1]} : vector<8x128xf32> to vector<8x32xf32>
    %116 = vector.extract_strided_slice %114 {offsets = [0, 32], sizes = [8, 32], strides = [1, 1]} : vector<8x128xf32> to vector<8x32xf32>
    %117 = vector.extract_strided_slice %114 {offsets = [0, 64], sizes = [8, 32], strides = [1, 1]} : vector<8x128xf32> to vector<8x32xf32>
    %118 = vector.extract_strided_slice %114 {offsets = [0, 96], sizes = [8, 32], strides = [1, 1]} : vector<8x128xf32> to vector<8x32xf32>
    %119 = arith.mulf %116, %103 : vector<8x32xf32>
    %120 = arith.mulf %115, %117 : vector<8x32xf32>
    %121 = arith.addf %119, %120 : vector<8x32xf32>
    %122 = math.tanh %121 : vector<8x32xf32>
    %123 = arith.mulf %118, %122 : vector<8x32xf32>
    %c2_i32 = arith.constant 2 : i32
    %124 = arith.index_cast %c2_i32 : i32 to index
    %c0_79 = arith.constant 0 : index
    %c0_80 = arith.constant 0 : index
    %125 = vector.load %arg13[%124, %c0_79, %c0_80] : memref<8x8x128xf32, #tpu.memory_space<vmem>>, vector<1x8x128xf32>
    %126 = vector.shape_cast %125 : vector<1x8x128xf32> to vector<8x128xf32>
    %cst_81 = arith.constant dense<0.000000e+00> : vector<8x128xf32>
    %127 = tpu.matmul %123, %0, %cst_81 {dimension_numbers = #tpu.dot_dimension_numbers<[1], [0], [0], [1], [0, 0, 1, 1], [], []>} : vector<8x32xf32>, vector<32x128xf32>, vector<8x128xf32> -> vector<8x128xf32>
    %128 = arith.addf %126, %127 : vector<8x128xf32>
    %129 = arith.mulf %128, %82 : vector<8x128xf32>
    %130 = math.tanh %129 : vector<8x128xf32>
    %131 = arith.mulf %130, %82 : vector<8x128xf32>
    %132 = arith.addf %131, %85 : vector<8x128xf32>
    %133 = vector.extract_strided_slice %132 {offsets = [0, 0], sizes = [8, 32], strides = [1, 1]} : vector<8x128xf32> to vector<8x32xf32>
    %134 = vector.extract_strided_slice %132 {offsets = [0, 32], sizes = [8, 32], strides = [1, 1]} : vector<8x128xf32> to vector<8x32xf32>
    %135 = vector.extract_strided_slice %132 {offsets = [0, 64], sizes = [8, 32], strides = [1, 1]} : vector<8x128xf32> to vector<8x32xf32>
    %136 = vector.extract_strided_slice %132 {offsets = [0, 96], sizes = [8, 32], strides = [1, 1]} : vector<8x128xf32> to vector<8x32xf32>
    %137 = arith.mulf %134, %121 : vector<8x32xf32>
    %138 = arith.mulf %133, %135 : vector<8x32xf32>
    %139 = arith.addf %137, %138 : vector<8x32xf32>
    %140 = math.tanh %139 : vector<8x32xf32>
    %141 = arith.mulf %136, %140 : vector<8x32xf32>
    %c3_i32 = arith.constant 3 : i32
    %142 = arith.index_cast %c3_i32 : i32 to index
    %c0_82 = arith.constant 0 : index
    %c0_83 = arith.constant 0 : index
    %143 = vector.load %arg13[%142, %c0_82, %c0_83] : memref<8x8x128xf32, #tpu.memory_space<vmem>>, vector<1x8x128xf32>
    %144 = vector.shape_cast %143 : vector<1x8x128xf32> to vector<8x128xf32>
    %cst_84 = arith.constant dense<0.000000e+00> : vector<8x128xf32>
    %145 = tpu.matmul %141, %0, %cst_84 {dimension_numbers = #tpu.dot_dimension_numbers<[1], [0], [0], [1], [0, 0, 1, 1], [], []>} : vector<8x32xf32>, vector<32x128xf32>, vector<8x128xf32> -> vector<8x128xf32>
    %146 = arith.addf %144, %145 : vector<8x128xf32>
    %147 = arith.mulf %146, %82 : vector<8x128xf32>
    %148 = math.tanh %147 : vector<8x128xf32>
    %149 = arith.mulf %148, %82 : vector<8x128xf32>
    %150 = arith.addf %149, %85 : vector<8x128xf32>
    %151 = vector.extract_strided_slice %150 {offsets = [0, 0], sizes = [8, 32], strides = [1, 1]} : vector<8x128xf32> to vector<8x32xf32>
    %152 = vector.extract_strided_slice %150 {offsets = [0, 32], sizes = [8, 32], strides = [1, 1]} : vector<8x128xf32> to vector<8x32xf32>
    %153 = vector.extract_strided_slice %150 {offsets = [0, 64], sizes = [8, 32], strides = [1, 1]} : vector<8x128xf32> to vector<8x32xf32>
    %154 = vector.extract_strided_slice %150 {offsets = [0, 96], sizes = [8, 32], strides = [1, 1]} : vector<8x128xf32> to vector<8x32xf32>
    %155 = arith.mulf %152, %139 : vector<8x32xf32>
    %156 = arith.mulf %151, %153 : vector<8x32xf32>
    %157 = arith.addf %155, %156 : vector<8x32xf32>
    %158 = math.tanh %157 : vector<8x32xf32>
    %159 = arith.mulf %154, %158 : vector<8x32xf32>
    %c4_i32 = arith.constant 4 : i32
    %160 = arith.index_cast %c4_i32 : i32 to index
    %c0_85 = arith.constant 0 : index
    %c0_86 = arith.constant 0 : index
    %161 = vector.load %arg13[%160, %c0_85, %c0_86] : memref<8x8x128xf32, #tpu.memory_space<vmem>>, vector<1x8x128xf32>
    %162 = vector.shape_cast %161 : vector<1x8x128xf32> to vector<8x128xf32>
    %cst_87 = arith.constant dense<0.000000e+00> : vector<8x128xf32>
    %163 = tpu.matmul %159, %0, %cst_87 {dimension_numbers = #tpu.dot_dimension_numbers<[1], [0], [0], [1], [0, 0, 1, 1], [], []>} : vector<8x32xf32>, vector<32x128xf32>, vector<8x128xf32> -> vector<8x128xf32>
    %164 = arith.addf %162, %163 : vector<8x128xf32>
    %165 = arith.mulf %164, %82 : vector<8x128xf32>
    %166 = math.tanh %165 : vector<8x128xf32>
    %167 = arith.mulf %166, %82 : vector<8x128xf32>
    %168 = arith.addf %167, %85 : vector<8x128xf32>
    %169 = vector.extract_strided_slice %168 {offsets = [0, 0], sizes = [8, 32], strides = [1, 1]} : vector<8x128xf32> to vector<8x32xf32>
    %170 = vector.extract_strided_slice %168 {offsets = [0, 32], sizes = [8, 32], strides = [1, 1]} : vector<8x128xf32> to vector<8x32xf32>
    %171 = vector.extract_strided_slice %168 {offsets = [0, 64], sizes = [8, 32], strides = [1, 1]} : vector<8x128xf32> to vector<8x32xf32>
    %172 = vector.extract_strided_slice %168 {offsets = [0, 96], sizes = [8, 32], strides = [1, 1]} : vector<8x128xf32> to vector<8x32xf32>
    %173 = arith.mulf %170, %157 : vector<8x32xf32>
    %174 = arith.mulf %169, %171 : vector<8x32xf32>
    %175 = arith.addf %173, %174 : vector<8x32xf32>
    %176 = math.tanh %175 : vector<8x32xf32>
    %177 = arith.mulf %172, %176 : vector<8x32xf32>
    %c5_i32 = arith.constant 5 : i32
    %178 = arith.index_cast %c5_i32 : i32 to index
    %c0_88 = arith.constant 0 : index
    %c0_89 = arith.constant 0 : index
    %179 = vector.load %arg13[%178, %c0_88, %c0_89] : memref<8x8x128xf32, #tpu.memory_space<vmem>>, vector<1x8x128xf32>
    %180 = vector.shape_cast %179 : vector<1x8x128xf32> to vector<8x128xf32>
    %cst_90 = arith.constant dense<0.000000e+00> : vector<8x128xf32>
    %181 = tpu.matmul %177, %0, %cst_90 {dimension_numbers = #tpu.dot_dimension_numbers<[1], [0], [0], [1], [0, 0, 1, 1], [], []>} : vector<8x32xf32>, vector<32x128xf32>, vector<8x128xf32> -> vector<8x128xf32>
    %182 = arith.addf %180, %181 : vector<8x128xf32>
    %183 = arith.mulf %182, %82 : vector<8x128xf32>
    %184 = math.tanh %183 : vector<8x128xf32>
    %185 = arith.mulf %184, %82 : vector<8x128xf32>
    %186 = arith.addf %185, %85 : vector<8x128xf32>
    %187 = vector.extract_strided_slice %186 {offsets = [0, 0], sizes = [8, 32], strides = [1, 1]} : vector<8x128xf32> to vector<8x32xf32>
    %188 = vector.extract_strided_slice %186 {offsets = [0, 32], sizes = [8, 32], strides = [1, 1]} : vector<8x128xf32> to vector<8x32xf32>
    %189 = vector.extract_strided_slice %186 {offsets = [0, 64], sizes = [8, 32], strides = [1, 1]} : vector<8x128xf32> to vector<8x32xf32>
    %190 = vector.extract_strided_slice %186 {offsets = [0, 96], sizes = [8, 32], strides = [1, 1]} : vector<8x128xf32> to vector<8x32xf32>
    %191 = arith.mulf %188, %175 : vector<8x32xf32>
    %192 = arith.mulf %187, %189 : vector<8x32xf32>
    %193 = arith.addf %191, %192 : vector<8x32xf32>
    %194 = math.tanh %193 : vector<8x32xf32>
    %195 = arith.mulf %190, %194 : vector<8x32xf32>
    %c6_i32 = arith.constant 6 : i32
    %196 = arith.index_cast %c6_i32 : i32 to index
    %c0_91 = arith.constant 0 : index
    %c0_92 = arith.constant 0 : index
    %197 = vector.load %arg13[%196, %c0_91, %c0_92] : memref<8x8x128xf32, #tpu.memory_space<vmem>>, vector<1x8x128xf32>
    %198 = vector.shape_cast %197 : vector<1x8x128xf32> to vector<8x128xf32>
    %cst_93 = arith.constant dense<0.000000e+00> : vector<8x128xf32>
    %199 = tpu.matmul %195, %0, %cst_93 {dimension_numbers = #tpu.dot_dimension_numbers<[1], [0], [0], [1], [0, 0, 1, 1], [], []>} : vector<8x32xf32>, vector<32x128xf32>, vector<8x128xf32> -> vector<8x128xf32>
    %200 = arith.addf %198, %199 : vector<8x128xf32>
    %201 = arith.mulf %200, %82 : vector<8x128xf32>
    %202 = math.tanh %201 : vector<8x128xf32>
    %203 = arith.mulf %202, %82 : vector<8x128xf32>
    %204 = arith.addf %203, %85 : vector<8x128xf32>
    %205 = vector.extract_strided_slice %204 {offsets = [0, 0], sizes = [8, 32], strides = [1, 1]} : vector<8x128xf32> to vector<8x32xf32>
    %206 = vector.extract_strided_slice %204 {offsets = [0, 32], sizes = [8, 32], strides = [1, 1]} : vector<8x128xf32> to vector<8x32xf32>
    %207 = vector.extract_strided_slice %204 {offsets = [0, 64], sizes = [8, 32], strides = [1, 1]} : vector<8x128xf32> to vector<8x32xf32>
    %208 = vector.extract_strided_slice %204 {offsets = [0, 96], sizes = [8, 32], strides = [1, 1]} : vector<8x128xf32> to vector<8x32xf32>
    %209 = arith.mulf %206, %193 : vector<8x32xf32>
    %210 = arith.mulf %205, %207 : vector<8x32xf32>
    %211 = arith.addf %209, %210 : vector<8x32xf32>
    %212 = math.tanh %211 : vector<8x32xf32>
    %213 = arith.mulf %208, %212 : vector<8x32xf32>
    %c7_i32 = arith.constant 7 : i32
    %214 = arith.index_cast %c7_i32 : i32 to index
    %c0_94 = arith.constant 0 : index
    %c0_95 = arith.constant 0 : index
    %215 = vector.load %arg13[%214, %c0_94, %c0_95] : memref<8x8x128xf32, #tpu.memory_space<vmem>>, vector<1x8x128xf32>
    %216 = vector.shape_cast %215 : vector<1x8x128xf32> to vector<8x128xf32>
    %cst_96 = arith.constant dense<0.000000e+00> : vector<8x128xf32>
    %217 = tpu.matmul %213, %0, %cst_96 {dimension_numbers = #tpu.dot_dimension_numbers<[1], [0], [0], [1], [0, 0, 1, 1], [], []>} : vector<8x32xf32>, vector<32x128xf32>, vector<8x128xf32> -> vector<8x128xf32>
    %218 = arith.addf %216, %217 : vector<8x128xf32>
    %219 = arith.mulf %218, %82 : vector<8x128xf32>
    %220 = math.tanh %219 : vector<8x128xf32>
    %221 = arith.mulf %220, %82 : vector<8x128xf32>
    %222 = arith.addf %221, %85 : vector<8x128xf32>
    %223 = vector.extract_strided_slice %222 {offsets = [0, 0], sizes = [8, 32], strides = [1, 1]} : vector<8x128xf32> to vector<8x32xf32>
    %224 = vector.extract_strided_slice %222 {offsets = [0, 32], sizes = [8, 32], strides = [1, 1]} : vector<8x128xf32> to vector<8x32xf32>
    %225 = vector.extract_strided_slice %222 {offsets = [0, 64], sizes = [8, 32], strides = [1, 1]} : vector<8x128xf32> to vector<8x32xf32>
    %226 = vector.extract_strided_slice %222 {offsets = [0, 96], sizes = [8, 32], strides = [1, 1]} : vector<8x128xf32> to vector<8x32xf32>
    %227 = arith.mulf %224, %211 : vector<8x32xf32>
    %228 = arith.mulf %223, %225 : vector<8x32xf32>
    %229 = arith.addf %227, %228 : vector<8x32xf32>
    %230 = math.tanh %229 : vector<8x32xf32>
    %231 = arith.mulf %226, %230 : vector<8x32xf32>
    %c8_i32 = arith.constant 8 : i32
    %c0_97 = arith.constant 0 : index
    %c0_98 = arith.constant 0 : index
    %232 = vector.load %arg1[%c0_97, %c0_98] : memref<8x128xf32, #tpu.memory_space<vmem>>, vector<8x6xf32>
    %c0_99 = arith.constant 0 : index
    %c0_100 = arith.constant 0 : index
    %233 = vector.load %arg5[%c0_99, %c0_100] : memref<6x32xf32, #tpu.memory_space<vmem>>, vector<6x32xf32>
    %cst_101 = arith.constant dense<0.000000e+00> : vector<8x32xf32>
    %234 = tpu.matmul %232, %233, %cst_101 {dimension_numbers = #tpu.dot_dimension_numbers<[1], [0], [0], [1], [0, 0, 1, 1], [], []>} : vector<8x6xf32>, vector<6x32xf32>, vector<8x32xf32> -> vector<8x32xf32>
    %c0_102 = arith.constant 0 : index
    %c0_103 = arith.constant 0 : index
    %235 = vector.load %arg6[%c0_102, %c0_103] : memref<32x32xf32, #tpu.memory_space<vmem>>, vector<32x32xf32>
    %cst_104 = arith.constant dense<0.000000e+00> : vector<8x32xf32>
    %236 = tpu.matmul %231, %235, %cst_104 {dimension_numbers = #tpu.dot_dimension_numbers<[1], [0], [0], [1], [0, 0, 1, 1], [], []>} : vector<8x32xf32>, vector<32x32xf32>, vector<8x32xf32> -> vector<8x32xf32>
    %237 = arith.addf %234, %236 : vector<8x32xf32>
    %c0_105 = arith.constant 0 : index
    %c0_106 = arith.constant 0 : index
    %238 = vector.load %arg7[%c0_105, %c0_106] : memref<1x32xf32, #tpu.memory_space<vmem>>, vector<1x32xf32>
    %239 = vector.broadcast %238 : vector<1x32xf32> to vector<8x32xf32>
    %240 = arith.addf %237, %239 : vector<8x32xf32>
    %cst_107 = arith.constant 0.000000e+00 : f32
    %241 = vector.broadcast %cst_107 : f32 to vector<8x32xf32>
    %242 = arith.maximumf %240, %241 : vector<8x32xf32>
    %c0_108 = arith.constant 0 : index
    %c0_109 = arith.constant 0 : index
    %243 = vector.load %arg8[%c0_108, %c0_109] : memref<32x32xf32, #tpu.memory_space<vmem>>, vector<32x32xf32>
    %cst_110 = arith.constant dense<0.000000e+00> : vector<8x32xf32>
    %244 = tpu.matmul %242, %243, %cst_110 {dimension_numbers = #tpu.dot_dimension_numbers<[1], [0], [0], [1], [0, 0, 1, 1], [], []>} : vector<8x32xf32>, vector<32x32xf32>, vector<8x32xf32> -> vector<8x32xf32>
    %c0_111 = arith.constant 0 : index
    %c0_112 = arith.constant 0 : index
    %245 = vector.load %arg9[%c0_111, %c0_112] : memref<1x32xf32, #tpu.memory_space<vmem>>, vector<1x32xf32>
    %246 = vector.broadcast %245 : vector<1x32xf32> to vector<8x32xf32>
    %247 = arith.addf %244, %246 : vector<8x32xf32>
    %cst_113 = arith.constant 0.000000e+00 : f32
    %248 = vector.broadcast %cst_113 : f32 to vector<8x32xf32>
    %249 = arith.maximumf %247, %248 : vector<8x32xf32>
    %c0_114 = arith.constant 0 : index
    %c0_115 = arith.constant 0 : index
    %250 = vector.load %arg10[%c0_114, %c0_115] : memref<1x32xf32, #tpu.memory_space<vmem>>, vector<1x32xf32>
    %251 = vector.broadcast %250 : vector<1x32xf32> to vector<8x32xf32>
    %252 = arith.mulf %249, %251 : vector<8x32xf32>
    %cst_116 = arith.constant dense<0.000000e+00> : vector<8xf32>
    %253 = vector.multi_reduction <add>, %252, %cst_116 [1] : vector<8x32xf32> to vector<8xf32>
    %254 = vector.shape_cast %253 : vector<8xf32> to vector<8x1xf32>
    %c0_117 = arith.constant 0 : index
    %c0_118 = arith.constant 0 : index
    %255 = vector.load %arg11[%c0_117, %c0_118] : memref<1x1xf32, #tpu.memory_space<vmem>>, vector<1x1xf32>
    %256 = vector.broadcast %255 : vector<1x1xf32> to vector<8x1xf32>
    %257 = arith.addf %254, %256 : vector<8x1xf32>
    %c0_119 = arith.constant 0 : index
    %c0_120 = arith.constant 0 : index
    %258 = vector.load %arg12[%c0_119, %c0_120] : memref<8x1xf32, #tpu.memory_space<vmem>>, vector<8x1xf32>
    tpu.vector_store %arg12[%c0_119, %c0_120], %257 {strides = array<i32>} : memref<8x1xf32, #tpu.memory_space<vmem>>, vector<8x1xf32>,
    return
  }
  func.func @transform_0(%arg0: i32) -> (i32, i32) {
    %c0_i32 = arith.constant 0 : i32
    %c0_i32_0 = arith.constant 0 : i32
    return %arg0, %c0_i32 : i32, i32
  }
  func.func @transform_1(%arg0: i32) -> (i32, i32, i32) {
    %c0_i32 = arith.constant 0 : i32
    %c0_i32_0 = arith.constant 0 : i32
    %c0_i32_1 = arith.constant 0 : i32
    %c0_i32_2 = arith.constant 0 : i32
    return %c0_i32, %c0_i32_0, %c0_i32_1 : i32, i32, i32
  }
  func.func @transform_2(%arg0: i32) -> (i32, i32) {
    %c0_i32 = arith.constant 0 : i32
    %c0_i32_0 = arith.constant 0 : i32
    %c0_i32_1 = arith.constant 0 : i32
    return %c0_i32, %c0_i32_0 : i32, i32
  }
  func.func @transform_3(%arg0: i32) -> (i32, i32) {
    %c0_i32 = arith.constant 0 : i32
    %c0_i32_0 = arith.constant 0 : i32
    %c0_i32_1 = arith.constant 0 : i32
    return %c0_i32, %c0_i32_0 : i32, i32
  }
  func.func @transform_4(%arg0: i32) -> (i32, i32) {
    %c0_i32 = arith.constant 0 : i32
    %c0_i32_0 = arith.constant 0 : i32
    %c0_i32_1 = arith.constant 0 : i32
    return %c0_i32, %c0_i32_0 : i32, i32
  }
  func.func @transform_5(%arg0: i32) -> (i32, i32) {
    %c0_i32 = arith.constant 0 : i32
    %c0_i32_0 = arith.constant 0 : i32
    %c0_i32_1 = arith.constant 0 : i32
    return %c0_i32, %c0_i32_0 : i32, i32
  }
  func.func @transform_6(%arg0: i32) -> (i32, i32) {
    %c0_i32 = arith.constant 0 : i32
    %c0_i32_0 = arith.constant 0 : i32
    %c0_i32_1 = arith.constant 0 : i32
    return %c0_i32, %c0_i32_0 : i32, i32
  }
  func.func @transform_7(%arg0: i32) -> (i32, i32) {
    %c0_i32 = arith.constant 0 : i32
    %c0_i32_0 = arith.constant 0 : i32
    %c0_i32_1 = arith.constant 0 : i32
    return %c0_i32, %c0_i32_0 : i32, i32
  }
  func.func @transform_8(%arg0: i32) -> (i32, i32) {
    %c0_i32 = arith.constant 0 : i32
    %c0_i32_0 = arith.constant 0 : i32
    %c0_i32_1 = arith.constant 0 : i32
    return %c0_i32, %c0_i32_0 : i32, i32
  }
  func.func @transform_9(%arg0: i32) -> (i32, i32) {
    %c0_i32 = arith.constant 0 : i32
    %c0_i32_0 = arith.constant 0 : i32
    %c0_i32_1 = arith.constant 0 : i32
    return %c0_i32, %c0_i32_0 : i32, i32
  }
  func.func @transform_10(%arg0: i32) -> (i32, i32) {
    %c0_i32 = arith.constant 0 : i32
    %c0_i32_0 = arith.constant 0 : i32
    %c0_i32_1 = arith.constant 0 : i32
    return %c0_i32, %c0_i32_0 : i32, i32
  }
  func.func @transform_11(%arg0: i32) -> (i32, i32) {
    %c0_i32 = arith.constant 0 : i32
    %c0_i32_0 = arith.constant 0 : i32
    return %arg0, %c0_i32 : i32, i32
  }
}

</mosaic_0001>

<bundles_post_ra>
// kernel: tpu_custom_call.1
= control target key start
LH: loop header
LB: loop body
LE: loop exit
PB: predicated region body
PF: predicated region fallthrough
CT: control target
= control target key end

     0   :  { %s3352_s0 = inlined_call_operand.hbm [shape: f32[8,128], index: 0, kind: input, shape index: {}]   ;;  %s3353_s1 = inlined_call_operand.hbm [shape: f32[8,128,128], index: 1, kind: input, shape index: {}]   ;;  %s3354_s2 = inlined_call_operand.vmem [shape: f32[1,128], index: 2, kind: input, shape index: {}]   ;;  %s3355_s3 = inlined_call_operand.hbm [shape: f32[32,128], index: 3, kind: input, shape index: {}]   ;;  %s3356_s4 = inlined_call_operand.vmem [shape: f32[6,32], index: 4, kind: input, shape index: {}]   ;;  %s3357_s5 = inlined_call_operand.hbm [shape: f32[32,32], index: 5, kind: input, shape index: {}]   ;;  %s3358_s6 = inlined_call_operand.vmem [shape: f32[1,32], index: 6, kind: input, shape index: {}]   ;;  %s3359_s7 = inlined_call_operand.hbm [shape: f32[32,32], index: 7, kind: input, shape index: {}]   ;;  %s3360_s8 = inlined_call_operand.vmem [shape: f32[1,32], index: 8, kind: input, shape index: {}]   ;;  %s3361_s9 = inlined_call_operand.vmem [shape: f32[1,32], index: 9, kind: input, shape index: {}]   ;;  %s3362_s10 = inlined_call_operand.<no memory space> [shape: f32[1,1], index: 10, kind: input, shape index: {}]   ;;  %s3363_s11 = inlined_call_operand.vmem [shape: f32[8,1], index: 11, kind: output, shape index: {}]  }
   0x1   :  { %v16_v0 = vstv %s3362_s10 }
   0x2   :  { %17 = vst [vmem:[#allocation3] sm:$0x1] %v16_v0 }
   0x3   :  { %18 = vsyncpa [#allocation5], 0 }
   0x4   :  { %19 = vsyncpa [#allocation7], 0 }
   0x5   :  { %20 = vsyncpa [#allocation10], 0  ;;  %s2942_s19 = smov [#allocation6]   ;;  %s2826_s23 = scalar_lea.hbm %s3353_s1, 16384 }
   0x6   :  { %s36_s20 = sshll.u32 %s2942_s19, 4  ;;  %p2827_p0 = scmp.ne.s32.totalorder %s3353_s1, %s2826_s23  ;;  %s37_s20 = int_to_ptr.vmem [resolvable:$true] %s36_s20 }
   0x7   :  { %p2830_p1 = scmp.lt.u32.totalorder %s2826_s23, %s3353_s1 }
   0x9   :  { %p2832_p2 = pnand %p2830_p1, %p2827_p0 }
   0xb   :  { %2835 = shalt.err (!%p2832_p2)
}
   0xc   :  { %s2836_s10 = scalar_lea.vmem %s37_s20, 16384  ;;  %p2841_p4 = scmp.lt.s32.totalorder %s37_s20, %s37_s20 }
   0xd   :  { %p2837_p3 = scmp.ne.s32.totalorder %s37_s20, %s2836_s10  ;;  %p2842_p5 = scmp.lt.s32.totalorder %s2836_s10, %s2836_s10 }
   0xf   :  { %p2843_p6 = por %p2842_p5, %p2841_p4 }
  0x11   :  { %p2844_p7 = pnand %p2843_p6, %p2837_p3 }
  0x13   :  { %2847 = shalt.err (!%p2844_p7)
}
  0x14   :  { %s2943_s28 = smov 128   ;;  %s2944_s29 = smov 8  }
  0x15   :  { %42 = dma.hbm_to_vmem [thread:$0]  %s3353_s1, 16384, %s37_s20, [#allocation7], %s2943_s28, %s2943_s28, %s2944_s29  }
  0x16   :  { %s2945_s13 = smov [#allocation9]   ;;  %s2946_s15 = smov [#allocation4]  }
  0x17   :  { %s64_s14 = sshll.u32 %s2945_s13, 4  ;;  %s27_s16 = sshll.u32 %s2946_s15, 4  ;;  %s65_s14 = int_to_ptr.vmem [resolvable:$true] %s64_s14  ;;  %s28_s16 = int_to_ptr.vmem [resolvable:$true] %s27_s16 }
  0x18   :  { %s2848_s19 = scalar_lea.hbm %s3357_s5, 512 }
  0x19   :  { %p2849_p8 = scmp.ne.s32.totalorder %s3357_s5, %s2848_s19  ;;  %p2852_p9 = scmp.lt.u32.totalorder %s2848_s19, %s3357_s5 }
  0x1b   :  { %p2854_p10 = pnand %p2852_p9, %p2849_p8 }
  0x1d   :  { %2857 = shalt.err (!%p2854_p10)
}
  0x1e   :  { %s2858_s1 = scalar_lea.vmem %s65_s14, 512  ;;  %p2863_p12 = scmp.lt.s32.totalorder %s65_s14, %s65_s14 }
  0x1f   :  { %p2859_p11 = scmp.ne.s32.totalorder %s65_s14, %s2858_s1  ;;  %p2864_p13 = scmp.lt.s32.totalorder %s2858_s1, %s2858_s1 }
  0x21   :  { %p2865_p0 = por %p2864_p13, %p2863_p12 }
  0x23   :  { %p2866_p1 = pnand %p2865_p0, %p2859_p11 }
  0x25   :  { %2869 = shalt.err (!%p2866_p1)
}
  0x26   :  { %70 = dma.hbm_to_vmem [thread:$0]  %s3357_s5, 512, %s65_s14, [#allocation10], %s2943_s28, %s2943_s28, %s2944_s29  }
  0x27   :  { %s2870_s10 = scalar_lea.hbm %s3352_s0, 128 }
  0x28   :  { %p2871_p2 = scmp.ne.s32.totalorder %s3352_s0, %s2870_s10  ;;  %p2874_p3 = scmp.lt.u32.totalorder %s2870_s10, %s3352_s0 }
  0x2a   :  { %p2876_p4 = pnand %p2874_p3, %p2871_p2 }
  0x2c   :  { %2879 = shalt.err (!%p2876_p4)
}
  0x2d   :  { %s2880_s17 = scalar_lea.vmem %s28_s16, 128  ;;  %p2885_p6 = scmp.lt.s32.totalorder %s28_s16, %s28_s16 }
  0x2e   :  { %p2881_p5 = scmp.ne.s32.totalorder %s28_s16, %s2880_s17  ;;  %p2886_p7 = scmp.lt.s32.totalorder %s2880_s17, %s2880_s17 }
  0x30   :  { %p2887_p8 = por %p2886_p7, %p2885_p6 }
  0x32   :  { %p2888_p9 = pnand %p2887_p8, %p2881_p5 }
  0x34   :  { %2891 = shalt.err (!%p2888_p9)
}
  0x35   :  { %30 = dma.hbm_to_vmem [thread:$0]  %s3352_s0, 128, %s28_s16, [#allocation5]  }
  0x36   :  { %s2947_s18 = smov [#allocation8]   ;;  %s2948_s21 = smov [#allocation11]  }
  0x37   :  { %s50_s19 = sshll.u32 %s2947_s18, 4  ;;  %s78_s22 = sshll.u32 %s2948_s21, 4  ;;  %s51_s19 = int_to_ptr.vmem [resolvable:$true] %s50_s19  ;;  %s79_s22 = int_to_ptr.vmem [resolvable:$true] %s78_s22 }
  0x38   :  { %s2892_s1 = scalar_lea.hbm %s3355_s3, 512 }
  0x39   :  { %p2893_p10 = scmp.ne.s32.totalorder %s3355_s3, %s2892_s1  ;;  %p2896_p11 = scmp.lt.u32.totalorder %s2892_s1, %s3355_s3 }
  0x3b   :  { %p2898_p12 = pnand %p2896_p11, %p2893_p10 }
  0x3d   :  { %2901 = shalt.err (!%p2898_p12)
}
  0x3e   :  { %s2902_s0 = scalar_lea.vmem %s51_s19, 512  ;;  %p2907_p0 = scmp.lt.s32.totalorder %s51_s19, %s51_s19 }
  0x3f   :  { %p2903_p13 = scmp.ne.s32.totalorder %s51_s19, %s2902_s0  ;;  %p2908_p1 = scmp.lt.s32.totalorder %s2902_s0, %s2902_s0 }
  0x41   :  { %p2909_p2 = por %p2908_p1, %p2907_p0 }
  0x43   :  { %p2910_p3 = pnand %p2909_p2, %p2903_p13 }
  0x45   :  { %2913 = shalt.err (!%p2910_p3)
}
  0x46   :  { %56 = dma.hbm_to_vmem [thread:$0]  %s3355_s3, 512, %s51_s19, [#allocation7], %s2943_s28, %s2943_s28, %s2944_s29  }
  0x47   :  { %s2914_s13 = scalar_lea.hbm %s3359_s7, 512 }
  0x48   :  { %p2915_p4 = scmp.ne.s32.totalorder %s3359_s7, %s2914_s13  ;;  %p2918_p5 = scmp.lt.u32.totalorder %s2914_s13, %s3359_s7 }
  0x4a   :  { %p2920_p6 = pnand %p2918_p5, %p2915_p4 }
  0x4c   :  { %2923 = shalt.err (!%p2920_p6)
}
  0x4d   :  { %s2924_s18 = scalar_lea.vmem %s79_s22, 512  ;;  %p2929_p8 = scmp.lt.s32.totalorder %s79_s22, %s79_s22 }
  0x4e   :  { %p2925_p7 = scmp.ne.s32.totalorder %s79_s22, %s2924_s18  ;;  %p2930_p9 = scmp.lt.s32.totalorder %s2924_s18, %s2924_s18 }
  0x50   :  { %p2931_p10 = por %p2930_p9, %p2929_p8 }
  0x52   :  { %p2932_p11 = pnand %p2931_p10, %p2925_p7 }
  0x54   :  { %2935 = shalt.err (!%p2932_p11)
}
  0x55   :  { %84 = dma.hbm_to_vmem [thread:$0]  %s3359_s7, 512, %s79_s22, [#allocation10], %s2943_s28, %s2943_s28, %s2944_s29  }
  0x56   :  { %2936 = dma.done.wait [#allocation5], 128  }
  0x57   :  { %2937 = vsyncadd [#allocation5], 4294967168 }
  0x58   :  { %2938 = dma.done.wait [#allocation7], 16896  }
  0x59   :  { %2939 = vsyncadd [#allocation7], 4294950400 }
  0x5a   :  { %2940 = dma.done.wait [#allocation10], 1024  }
  0x5b   :  { %2941 = vsyncadd [#allocation10], 4294966272  ;;  %v2949_v1 = vmov 0.0|0.0   ;;  %vm2950_vm0 = vmmov 0   ;;  %v2951_v2 = vmov 0.0   ;;  %v112_v3 = vld [vmem:[#allocation6] sm:$0xff] }
  0x5c   :  { %2505 = vmatprep.subr.bf16.mxu0 %v2949_v1  ;;  %2142 = vmatprep.mubr.msk.f32.mxu0 %vm2950_vm0, %v2951_v2  ;;  %v113_v4 = vld [vmem:[#allocation6 + $0x8] sm:$0xff]  ;;  %v114_v5 = vld [vmem:[#allocation6 + $0x10] sm:$0xff]  ;;  %v115_v7 = vld [vmem:[#allocation6 + $0x18] sm:$0xff]  ;;  %s2954_s29 = smov 32   ;;  %vm843_vm4 = vcmask 261120   ;;  %vm1710_vm5 = vcmask 1045504  }
  0x5d   :  { %2529 = vmatprep.subr.bf16.mxu1 %v2949_v1  ;;  %2177 = vmatprep.mubr.msk.f32.mxu1 %vm2950_vm0, %v2951_v2  ;;  %v2506_v6 = vpack.c.bf16 %v113_v4, %v112_v3  ;;  %v2509_v8 = vpack.c.bf16 %v115_v7, %v114_v5  ;;  %v116_v9 = vld [vmem:[#allocation6 + $0x20] sm:$0xff]  ;;  %v117_v10 = vld [vmem:[#allocation6 + $0x28] sm:$0xff]  ;;  %v118_v12 = vld [vmem:[#allocation6 + $0x30] sm:$0xff]  ;;  %vm1706_vm6 = vcmask 48128   ;;  %vm1897_vm7 = vcmask 7168  }
  0x5e   :  { %v2512_v11 = vpack.c.bf16 %v117_v10, %v116_v9  ;;  %v119_v13 = vld [vmem:[#allocation6 + $0x38] sm:$0xff]  ;;  %v120_v15 = vld [vmem:[#allocation6 + $0x40] sm:$0xff]  ;;  %v121_v16 = vld [vmem:[#allocation6 + $0x48] sm:$0xff] }
  0x5f   :  { %2507 = vmatpush3.bf16.msra.mxu0 %v2506_v6  ;;  %v2515_v14 = vpack.c.bf16 %v119_v13, %v118_v12  ;;  %v2518_v17 = vpack.c.bf16 %v121_v16, %v120_v15  ;;  %v122_v18 = vld [vmem:[#allocation6 + $0x50] sm:$0xff]  ;;  %v123_v19 = vld [vmem:[#allocation6 + $0x58] sm:$0xff]  ;;  %v124_v21 = vld [vmem:[#allocation6 + $0x60] sm:$0xff] }
  0x60   :  { %2508 = vmatprep.subr.bf16.mxu0 %v2949_v1  ;;  %v2521_v20 = vpack.c.bf16 %v123_v19, %v122_v18  ;;  %v125_v22 = vld [vmem:[#allocation6 + $0x68] sm:$0xff]  ;;  %v126_v24 = vld [vmem:[#allocation6 + $0x70] sm:$0xff]  ;;  %v127_v25 = vld [vmem:[#allocation6 + $0x78] sm:$0xff] }
  0x61   :  { %v2524_v23 = vpack.c.bf16 %v125_v22, %v124_v21  ;;  %v2527_v26 = vpack.c.bf16 %v127_v25, %v126_v24  ;;  %v297_v27 = vld [vmem:[#allocation6 + $0x100] sm:$0xff]  ;;  %v298_v28 = vld [vmem:[#allocation6 + $0x108] sm:$0xff]  ;;  %v3103_v29 = vld [vmem:[#allocation4] sm:$0xff] }
  0x62   :  { %v2554_v30 = vpack.c.bf16 %v298_v28, %v297_v27  ;;  %v299_v31 = vld [vmem:[#allocation6 + $0x110] sm:$0xff]  ;;  %v300_v32 = vld [vmem:[#allocation6 + $0x118] sm:$0xff]  ;;  %v301_v34 = vld [vmem:[#allocation6 + $0x120] sm:$0xff] }
  0x63   :  { %2510 = vmatpush3.bf16.msra.mxu0 %v2509_v8  ;;  %v2557_v33 = vpack.c.bf16 %v300_v32, %v299_v31  ;;  %v302_v35 = vld [vmem:[#allocation6 + $0x128] sm:$0xff]  ;;  %v303_v37 = vld [vmem:[#allocation6 + $0x130] sm:$0xff]  ;;  %v304_v38 = vld [vmem:[#allocation6 + $0x138] sm:$0xff] }
  0x64   :  { %2511 = vmatprep.subr.bf16.mxu0 %v2949_v1  ;;  %v2560_v36 = vpack.c.bf16 %v302_v35, %v301_v34  ;;  %v2563_v39 = vpack.c.bf16 %v304_v38, %v303_v37  ;;  %v305_v40 = vld [vmem:[#allocation6 + $0x140] sm:$0xff]  ;;  %v306_v41 = vld [vmem:[#allocation6 + $0x148] sm:$0xff]  ;;  %v307_v43 = vld [vmem:[#allocation6 + $0x150] sm:$0xff] }
  0x65   :  { %v2566_v42 = vpack.c.bf16 %v306_v41, %v305_v40  ;;  %v308_v44 = vld [vmem:[#allocation6 + $0x158] sm:$0xff]  ;;  %v309_v46 = vld [vmem:[#allocation6 + $0x160] sm:$0xff]  ;;  %v310_v47 = vld [vmem:[#allocation6 + $0x168] sm:$0xff] }
  0x66   :  { %v2569_v45 = vpack.c.bf16 %v308_v44, %v307_v43  ;;  %v2572_v48 = vpack.c.bf16 %v310_v47, %v309_v46  ;;  %v311_v49 = vld [vmem:[#allocation6 + $0x170] sm:$0xff]  ;;  %v312_v50 = vld [vmem:[#allocation6 + $0x178] sm:$0xff]  ;;  %v477_v52 = vld [vmem:[#allocation6 + $0x200] sm:$0xff] }
  0x67   :  { %2513 = vmatpush3.bf16.msra.mxu0 %v2512_v11  ;;  %v2575_v51 = vpack.c.bf16 %v312_v50, %v311_v49  ;;  %v478_v53 = vld [vmem:[#allocation6 + $0x208] sm:$0xff]  ;;  %v479_v55 = vld [vmem:[#allocation6 + $0x210] sm:$0xff]  ;;  %v480_v56 = vld [vmem:[#allocation6 + $0x218] sm:$0xff] }
  0x68   :  { %2514 = vmatprep.subr.bf16.mxu0 %v2949_v1  ;;  %v2602_v54 = vpack.c.bf16 %v478_v53, %v477_v52  ;;  %v2605_v57 = vpack.c.bf16 %v480_v56, %v479_v55  ;;  %v481_v58 = vld [vmem:[#allocation6 + $0x220] sm:$0xff]  ;;  %v482_v59 = vld [vmem:[#allocation6 + $0x228] sm:$0xff]  ;;  %v483_v61 = vld [vmem:[#allocation6 + $0x230] sm:$0xff] }
  0x69   :  { %v2608_v60 = vpack.c.bf16 %v482_v59, %v481_v58  ;;  %v484_v62 = vld [vmem:[#allocation6 + $0x238] sm:$0xff]  ;;  %v485_v0 = vld [vmem:[#allocation6 + $0x240] sm:$0xff]  ;;  %v486_v3 = vld [vmem:[#allocation6 + $0x248] sm:$0xff] }
  0x6a   :  { %v2611_v63 = vpack.c.bf16 %v484_v62, %v483_v61  ;;  %v2614_v4 = vpack.c.bf16 %v486_v3, %v485_v0  ;;  %v487_v5 = vld [vmem:[#allocation6 + $0x250] sm:$0xff]  ;;  %v488_v6 = vld [vmem:[#allocation6 + $0x258] sm:$0xff]  ;;  %v489_v8 = vld [vmem:[#allocation6 + $0x260] sm:$0xff] }
  0x6b   :  { %2516 = vmatpush3.bf16.msra.mxu0 %v2515_v14  ;;  %v2617_v7 = vpack.c.bf16 %v488_v6, %v487_v5  ;;  %v490_v9 = vld [vmem:[#allocation6 + $0x268] sm:$0xff]  ;;  %v491_v11 = vld [vmem:[#allocation6 + $0x270] sm:$0xff]  ;;  %v492_v12 = vld [vmem:[#allocation6 + $0x278] sm:$0xff] }
  0x6c   :  { %2517 = vmatprep.subr.bf16.mxu0 %v2949_v1  ;;  %v2620_v10 = vpack.c.bf16 %v490_v9, %v489_v8  ;;  %v2623_v13 = vpack.c.bf16 %v492_v12, %v491_v11  ;;  %v657_v14 = vld [vmem:[#allocation6 + $0x300] sm:$0xff]  ;;  %v658_v15 = vld [vmem:[#allocation6 + $0x308] sm:$0xff]  ;;  %v660_v18 = vld [vmem:[#allocation6 + $0x318] sm:$0xff] }
  0x6d   :  { %v2650_v16 = vpack.c.bf16 %v658_v15, %v657_v14  ;;  %v662_v21 = vld [vmem:[#allocation6 + $0x328] sm:$0xff]  ;;  %v664_v24 = vld [vmem:[#allocation6 + $0x338] sm:$0xff]  ;;  %v3160_v47 = vld [vmem:[%s3354_s2] ss:$0 sm:$0xff]  ;;  %s2953_s2 = smov 64  }
  0x6e   :  { %v666_v27 = vld [vmem:[#allocation6 + $0x348] sm:$0xff]  ;;  %v668_v31 = vld [vmem:[#allocation6 + $0x358] sm:$0xff]  ;;  %v209_v62 = vld [vmem:[#allocation6 + $0x90] sm:$0xff] }
  0x6f   :  { %2519 = vmatpush3.bf16.msra.mxu0 %v2518_v17  ;;  %v659_v17 = vld [vmem:[#allocation6 + $0x310] sm:$0xff]  ;;  %v670_v34 = vld [vmem:[#allocation6 + $0x368] sm:$0xff]  ;;  %v672_v37 = vld [vmem:[#allocation6 + $0x378] sm:$0xff] }
  0x70   :  { %2520 = vmatprep.subr.bf16.mxu0 %v2949_v1  ;;  %v2653_v19 = vpack.c.bf16 %v660_v18, %v659_v17  ;;  %v107_v40 = vld [vmem:[#allocation8 + $0x8] sm:$0xff]  ;;  %v109_v43 = vld [vmem:[#allocation8 + $0x18] sm:$0xff]  ;;  %v217_v15 = vld [vmem:[#allocation6 + $0xd0] sm:$0xff] }
  0x71   :  { %v208_v61 = vld [vmem:[#allocation6 + $0x88] sm:$0xff]  ;;  %v210_v0 = vld [vmem:[#allocation6 + $0x98] sm:$0xff] }
  0x72   :  { %v2533_v3 = vpack.c.bf16 %v210_v0, %v209_v62  ;;  %v212_v5 = vld [vmem:[#allocation6 + $0xa8] sm:$0xff]  ;;  %v214_v8 = vld [vmem:[#allocation6 + $0xb8] sm:$0xff] }
  0x73   :  { %2522 = vmatpush3.bf16.msra.mxu0 %v2521_v20  ;;  %v661_v20 = vld [vmem:[#allocation6 + $0x320] sm:$0xff]  ;;  %v216_v11 = vld [vmem:[#allocation6 + $0xc8] sm:$0xff] }
  0x74   :  { %2523 = vmatprep.subr.bf16.mxu0 %v2949_v1  ;;  %v2656_v22 = vpack.c.bf16 %v662_v21, %v661_v20  ;;  %v220_v20 = vld [vmem:[#allocation6 + $0xe8] sm:$0xff] }
  0x75   :  { %v572_v0 = vld [vmem:[#allocation6 + $0x2a8] sm:$0xff] }
  0x77   :  { %2525 = vmatpush3.bf16.msra.mxu0 %v2524_v23  ;;  %v663_v23 = vld [vmem:[#allocation6 + $0x330] sm:$0xff] }
  0x78   :  { %2526 = vmatprep.subr.bf16.mxu0 %v2949_v1  ;;  %v2659_v25 = vpack.c.bf16 %v664_v24, %v663_v23  ;;  %v222_v23 = vld [vmem:[#allocation6 + $0xf8] sm:$0xff] }
  0x7b   :  { %2528 = vmatpush3.bf16.msra.mxu0 %v2527_v26  ;;  %v665_v26 = vld [vmem:[#allocation6 + $0x340] sm:$0xff] }
  0x7c   :  { %2553 = vmatprep.subr.bf16.mxu0 %v2949_v1  ;;  %v2662_v28 = vpack.c.bf16 %v666_v27, %v665_v26  ;;  %v388_v26 = vld [vmem:[#allocation6 + $0x188] sm:$0xff] }
  0x7e   :  { %2143 = vmatmul.mubr.f32.vlgmr.msra.gmra.mrb[0].mxu0 %v3103_v29 }
  0x7f   :  { %2555 = vmatpush3.bf16.msra.mxu0 %v2554_v30  ;;  %2212 = vmatprep.mubr.msk.f32.mxu0 %vm2950_vm0, %v2951_v2  ;;  %v667_v30 = vld [vmem:[#allocation6 + $0x350] sm:$0xff] }
  0x80   :  { %2556 = vmatprep.subr.bf16.mxu0 %v2949_v1  ;;  %v2665_v32 = vpack.c.bf16 %v668_v31, %v667_v30  ;;  %v390_v30 = vld [vmem:[#allocation6 + $0x198] sm:$0xff] }
  0x83   :  { %2558 = vmatpush3.bf16.msra.mxu0 %v2557_v33  ;;  %v669_v33 = vld [vmem:[#allocation6 + $0x360] sm:$0xff] }
  0x84   :  { %2559 = vmatprep.subr.bf16.mxu0 %v2949_v1  ;;  %v2668_v35 = vpack.c.bf16 %v670_v34, %v669_v33  ;;  %v391_v33 = vld [vmem:[#allocation6 + $0x1a0] sm:$0xff]  ;;  %v392_v34 = vld [vmem:[#allocation6 + $0x1a8] sm:$0xff] }
  0x87   :  { %2561 = vmatpush3.bf16.msra.mxu0 %v2560_v36  ;;  %v671_v36 = vld [vmem:[#allocation6 + $0x370] sm:$0xff] }
  0x88   :  { %2562 = vmatprep.subr.bf16.mxu0 %v2949_v1  ;;  %v2671_v38 = vpack.c.bf16 %v672_v37, %v671_v36  ;;  %v393_v36 = vld [vmem:[#allocation6 + $0x1b0] sm:$0xff]  ;;  %v394_v37 = vld [vmem:[#allocation6 + $0x1b8] sm:$0xff] }
  0x8b   :  { %2564 = vmatpush3.bf16.msra.mxu0 %v2563_v39  ;;  %v106_v39 = vld [vmem:[#allocation8] sm:$0xff] }
  0x8c   :  { %2565 = vmatprep.subr.bf16.mxu0 %v2949_v1  ;;  %v3138_v41 = vpack.c.bf16 %v107_v40, %v106_v39  ;;  %v395_v39 = vld [vmem:[#allocation6 + $0x1c0] sm:$0xff]  ;;  %v396_v40 = vld [vmem:[#allocation6 + $0x1c8] sm:$0xff] }
  0x8f   :  { %2567 = vmatpush3.bf16.msra.mxu0 %v2566_v42  ;;  %v108_v42 = vld [vmem:[#allocation8 + $0x10] sm:$0xff] }
  0x90   :  { %2568 = vmatprep.subr.bf16.mxu0 %v2949_v1  ;;  %v3143_v44 = vpack.c.bf16 %v109_v43, %v108_v42  ;;  %v2590_v42 = vpack.c.bf16 %v396_v40, %v395_v39  ;;  %v397_v43 = vld [vmem:[#allocation6 + $0x1d0] sm:$0xff]  ;;  %v759_v39 = vld [vmem:[#allocation6 + $0x3e0] sm:$0xff]  ;;  %v760_v40 = vld [vmem:[#allocation6 + $0x3e8] sm:$0xff] }
  0x93   :  { %2570 = vmatpush3.bf16.msra.mxu0 %v2569_v45  ;;  %v835_v45 = vlaneseq }
  0x94   :  { %2571 = vmatprep.subr.bf16.mxu0 %v2949_v1 }
  0x95   :  { %v836_v46 = vand.u32 127, %v835_v45  ;;  %v398_v45 = vld [vmem:[#allocation6 + $0x1d8] sm:$0xff] }
  0x97   :  { %2573 = vmatpush3.bf16.msra.mxu0 %v2572_v48  ;;  %vm837_vm1 = vcmp.ge.s32.totalorder %v836_v46, 64  ;;  %vm838_vm2 = vcmp.lt.s32.totalorder %v836_v46, 96  ;;  %v2952_v48 = vmov 0.5   ;;  %v2593_v46 = vpack.c.bf16 %v398_v45, %v397_v43  ;;  %v761_v43 = vld [vmem:[#allocation6 + $0x3f0] sm:$0xff]  ;;  %v762_v45 = vld [vmem:[#allocation6 + $0x3f8] sm:$0xff] }
  0x98   :  { %2574 = vmatprep.subr.bf16.mxu0 %v2949_v1  ;;  %vm839_vm3 = vmand %vm837_vm1, %vm838_vm2 }
  0x99   :  { %v3162_v49 = vsel %vm839_vm3, 1.0, %v2952_v48  ;;  %v3166_v55 = vsel %vm839_vm3, 0.0, %v2952_v48  ;;  %v399_v48 = vld [vmem:[#allocation6 + $0x1e0] sm:$0xff] }
  0x9b   :  { %2576 = vmatpush3.bf16.msra.mxu0 %v2575_v51 }
  0x9c   :  { %2601 = vmatprep.subr.bf16.mxu0 %v2949_v1 }
  0x9e   :  { %2213 = vmatmul.mubr.f32.vlgmr.msra.gmra.mrb[2].mxu0 %v3103_v29 }
  0x9f   :  { %2603 = vmatpush3.bf16.msra.mxu0 %v2602_v54  ;;  %2282 = vmatprep.mubr.msk.f32.mxu0 %vm2950_vm0, %v2951_v2 }
  0xa0   :  { %2604 = vmatprep.subr.bf16.mxu0 %v2949_v1 }
  0xa3   :  { %2606 = vmatpush3.bf16.msra.mxu0 %v2605_v57 }
  0xa4   :  { %2607 = vmatprep.subr.bf16.mxu0 %v2949_v1 }
  0xa7   :  { %2609 = vmatpush3.bf16.msra.mxu0 %v2608_v60  ;;  %v207_v60 = vld [vmem:[#allocation6 + $0x80] sm:$0xff] }
  0xa8   :  { %2610 = vmatprep.subr.bf16.mxu0 %v2949_v1 }
  0xab   :  { %2612 = vmatpush3.bf16.msra.mxu0 %v2611_v63  ;;  %v2530_v63 = vpack.c.bf16 %v208_v61, %v207_v60  ;;  %v569_v60 = vld [vmem:[#allocation6 + $0x290] sm:$0xff]  ;;  %v570_v61 = vld [vmem:[#allocation6 + $0x298] sm:$0xff] }
  0xac   :  { %2613 = vmatprep.subr.bf16.mxu0 %v2949_v1  ;;  %v2629_v62 = vpack.c.bf16 %v570_v61, %v569_v60 }
  0xad   :  { %2531 = vmatpush3.bf16.msra.mxu1 %v2530_v63  ;;  %v571_v63 = vld [vmem:[#allocation6 + $0x2a0] sm:$0xff] }
  0xae   :  { %2532 = vmatprep.subr.bf16.mxu1 %v2949_v1 }
  0xaf   :  { %2615 = vmatpush3.bf16.msra.mxu0 %v2614_v4  ;;  %v211_v4 = vld [vmem:[#allocation6 + $0xa0] sm:$0xff] }
  0xb0   :  { %2616 = vmatprep.subr.bf16.mxu0 %v2949_v1  ;;  %v2536_v6 = vpack.c.bf16 %v212_v5, %v211_v4  ;;  %v573_v4 = vld [vmem:[#allocation6 + $0x2b0] sm:$0xff]  ;;  %v574_v5 = vld [vmem:[#allocation6 + $0x2b8] sm:$0xff] }
  0xb1   :  { %2534 = vmatpush3.bf16.msra.mxu1 %v2533_v3  ;;  %v2632_v3 = vpack.c.bf16 %v572_v0, %v571_v63 }
  0xb2   :  { %2535 = vmatprep.subr.bf16.mxu1 %v2949_v1 }
  0xb3   :  { %2618 = vmatpush3.bf16.msra.mxu0 %v2617_v7  ;;  %v213_v7 = vld [vmem:[#allocation6 + $0xb0] sm:$0xff] }
  0xb4   :  { %2619 = vmatprep.subr.bf16.mxu0 %v2949_v1  ;;  %v2539_v9 = vpack.c.bf16 %v214_v8, %v213_v7  ;;  %v575_v7 = vld [vmem:[#allocation6 + $0x2c0] sm:$0xff]  ;;  %v576_v8 = vld [vmem:[#allocation6 + $0x2c8] sm:$0xff] }
  0xb5   :  { %2537 = vmatpush3.bf16.msra.mxu1 %v2536_v6  ;;  %v2635_v6 = vpack.c.bf16 %v574_v5, %v573_v4 }
  0xb6   :  { %2538 = vmatprep.subr.bf16.mxu1 %v2949_v1 }
  0xb7   :  { %2621 = vmatpush3.bf16.msra.mxu0 %v2620_v10  ;;  %v215_v10 = vld [vmem:[#allocation6 + $0xc0] sm:$0xff] }
  0xb8   :  { %2622 = vmatprep.subr.bf16.mxu0 %v2949_v1  ;;  %v2542_v12 = vpack.c.bf16 %v216_v11, %v215_v10  ;;  %v577_v10 = vld [vmem:[#allocation6 + $0x2d0] sm:$0xff]  ;;  %v578_v11 = vld [vmem:[#allocation6 + $0x2d8] sm:$0xff] }
  0xb9   :  { %2540 = vmatpush3.bf16.msra.mxu1 %v2539_v9  ;;  %v2638_v9 = vpack.c.bf16 %v576_v8, %v575_v7 }
  0xba   :  { %2541 = vmatprep.subr.bf16.mxu1 %v2949_v1 }
  0xbb   :  { %2624 = vmatpush3.bf16.msra.mxu0 %v2623_v13 }
  0xbc   :  { %2649 = vmatprep.subr.bf16.mxu0 %v2949_v1 }
  0xbd   :  { %2543 = vmatpush3.bf16.msra.mxu1 %v2542_v12  ;;  %v2641_v12 = vpack.c.bf16 %v578_v11, %v577_v10 }
  0xbe   :  { %2283 = vmatmul.mubr.f32.vlgmr.msra.gmra.mrb[4].mxu0 %v3103_v29  ;;  %2544 = vmatprep.subr.bf16.mxu1 %v2949_v1 }
  0xbf   :  { %2651 = vmatpush3.bf16.msra.mxu0 %v2650_v16  ;;  %2352 = vmatprep.mubr.msk.f32.mxu0 %vm2950_vm0, %v2951_v2  ;;  %v218_v16 = vld [vmem:[#allocation6 + $0xd8] sm:$0xff] }
  0xc0   :  { %2652 = vmatprep.subr.bf16.mxu0 %v2949_v1  ;;  %v2545_v18 = vpack.c.bf16 %v218_v16, %v217_v15  ;;  %v581_v16 = vld [vmem:[#allocation6 + $0x2f0] sm:$0xff] }
  0xc2   :  { %2546 = vmatpush3.bf16.msra.mxu1 %v2545_v18  ;;  %v582_v18 = vld [vmem:[#allocation6 + $0x2f8] sm:$0xff] }
  0xc3   :  { %2654 = vmatpush3.bf16.msra.mxu0 %v2653_v19  ;;  %v219_v19 = vld [vmem:[#allocation6 + $0xe0] sm:$0xff]  ;;  %2547 = vmatprep.subr.bf16.mxu1 %v2949_v1 }
  0xc4   :  { %2655 = vmatprep.subr.bf16.mxu0 %v2949_v1  ;;  %v2548_v21 = vpack.c.bf16 %v220_v20, %v219_v19  ;;  %v2647_v19 = vpack.c.bf16 %v582_v18, %v581_v16  ;;  %v747_v20 = vld [vmem:[#allocation6 + $0x380] sm:$0xff] }
  0xc6   :  { %2549 = vmatpush3.bf16.msra.mxu1 %v2548_v21  ;;  %v748_v21 = vld [vmem:[#allocation6 + $0x388] sm:$0xff] }
  0xc7   :  { %2657 = vmatpush3.bf16.msra.mxu0 %v2656_v22  ;;  %v221_v22 = vld [vmem:[#allocation6 + $0xf0] sm:$0xff]  ;;  %2550 = vmatprep.subr.bf16.mxu1 %v2949_v1 }
  0xc8   :  { %2658 = vmatprep.subr.bf16.mxu0 %v2949_v1  ;;  %v2551_v24 = vpack.c.bf16 %v222_v23, %v221_v22  ;;  %v2674_v22 = vpack.c.bf16 %v748_v21, %v747_v20  ;;  %v749_v23 = vld [vmem:[#allocation6 + $0x390] sm:$0xff] }
  0xca   :  { %2552 = vmatpush3.bf16.msra.mxu1 %v2551_v24  ;;  %v750_v24 = vld [vmem:[#allocation6 + $0x398] sm:$0xff] }
  0xcb   :  { %2660 = vmatpush3.bf16.msra.mxu0 %v2659_v25  ;;  %v387_v25 = vld [vmem:[#allocation6 + $0x180] sm:$0xff]  ;;  %2577 = vmatprep.subr.bf16.mxu1 %v2949_v1 }
  0xcc   :  { %2661 = vmatprep.subr.bf16.mxu0 %v2949_v1  ;;  %v2578_v27 = vpack.c.bf16 %v388_v26, %v387_v25  ;;  %v2677_v25 = vpack.c.bf16 %v750_v24, %v749_v23  ;;  %v751_v26 = vld [vmem:[#allocation6 + $0x3a0] sm:$0xff] }
  0xcd   :  { %2178 = vmatmul.mubr.f32.vlgmr.msra.gmra.mrb[0].mxu1 %v3103_v29 }
  0xce   :  { %2579 = vmatpush3.bf16.msra.mxu1 %v2578_v27  ;;  %2247 = vmatprep.mubr.msk.f32.mxu1 %vm2950_vm0, %v2951_v2  ;;  %v752_v27 = vld [vmem:[#allocation6 + $0x3a8] sm:$0xff] }
  0xcf   :  { %2663 = vmatpush3.bf16.msra.mxu0 %v2662_v28  ;;  %v389_v28 = vld [vmem:[#allocation6 + $0x190] sm:$0xff]  ;;  %2580 = vmatprep.subr.bf16.mxu1 %v2949_v1 }
  0xd0   :  { %2664 = vmatprep.subr.bf16.mxu0 %v2949_v1 }
  0xd3   :  { %2666 = vmatpush3.bf16.msra.mxu0 %v2665_v32  ;;  %v2581_v32 = vpack.c.bf16 %v390_v30, %v389_v28  ;;  %v2680_v28 = vpack.c.bf16 %v752_v27, %v751_v26  ;;  %v753_v30 = vld [vmem:[#allocation6 + $0x3b0] sm:$0xff] }
  0xd4   :  { %2667 = vmatprep.subr.bf16.mxu0 %v2949_v1 }
  0xd5   :  { %2582 = vmatpush3.bf16.msra.mxu1 %v2581_v32 }
  0xd6   :  { %2583 = vmatprep.subr.bf16.mxu1 %v2949_v1 }
  0xd7   :  { %2669 = vmatpush3.bf16.msra.mxu0 %v2668_v35  ;;  %v2584_v35 = vpack.c.bf16 %v392_v34, %v391_v33  ;;  %v755_v33 = vld [vmem:[#allocation6 + $0x3c0] sm:$0xff]  ;;  %v756_v34 = vld [vmem:[#allocation6 + $0x3c8] sm:$0xff] }
  0xd8   :  { %2670 = vmatprep.subr.bf16.mxu0 %v2949_v1 }
  0xd9   :  { %2585 = vmatpush3.bf16.msra.mxu1 %v2584_v35  ;;  %v2686_v35 = vpack.c.bf16 %v756_v34, %v755_v33 }
  0xda   :  { %2586 = vmatprep.subr.bf16.mxu1 %v2949_v1 }
  0xdb   :  { %2672 = vmatpush3.bf16.msra.mxu0 %v2671_v38  ;;  %v2587_v38 = vpack.c.bf16 %v394_v37, %v393_v36  ;;  %v757_v36 = vld [vmem:[#allocation6 + $0x3d0] sm:$0xff]  ;;  %v758_v37 = vld [vmem:[#allocation6 + $0x3d8] sm:$0xff] }
  0xdc   :  { %2697 = vmatprep.subr.bf16.mxu0 %v2949_v1 }
  0xdd   :  { %2588 = vmatpush3.bf16.msra.mxu1 %v2587_v38  ;;  %v2689_v38 = vpack.c.bf16 %v758_v37, %v757_v36 }
  0xde   :  { %2353 = vmatmul.mubr.f32.vlgmr.msra.gmra.mrb[6].mxu0 %v3103_v29  ;;  %2589 = vmatprep.subr.bf16.mxu1 %v2949_v1 }
  0xdf   :  { %2699 = vmatpush3.bf16.msra.mxu0 %v3138_v41  ;;  %2398 = vmatprep.mubr.msk.f32.mxu0 %vm2950_vm0, %v2951_v2 }
  0xe0   :  { %2700 = vmatprep.subr.bf16.mxu0 %v2949_v1 }
  0xe1   :  { %2591 = vmatpush3.bf16.msra.mxu1 %v2590_v42  ;;  %v2692_v42 = vpack.c.bf16 %v760_v40, %v759_v39 }
  0xe2   :  { %2592 = vmatprep.subr.bf16.mxu1 %v2949_v1 }
  0xe3   :  { %2702 = vmatpush3.bf16.msra.mxu0 %v3143_v44 }
  0xe4   :  { %2709 = vmatprep.subr.bf16.mxu0 %v2949_v1 }
  0xe5   :  { %2594 = vmatpush3.bf16.msra.mxu1 %v2593_v46  ;;  %v2695_v46 = vpack.c.bf16 %v762_v45, %v761_v43 }
  0xe6   :  { %2399 = vmatmul.mubr.f32.vlgmr.msra.gmra.mrb[0].mxu0 %v2951_v2  ;;  %2595 = vmatprep.subr.bf16.mxu1 %v2949_v1 }
  0xe7   :  { %2711 = vmatpush3.bf16.msra.mxu0 %v3138_v41  ;;  %2420 = vmatprep.mubr.msk.f32.mxu0 %vm2950_vm0, %v2951_v2 }
  0xe8   :  { %2712 = vmatprep.subr.bf16.mxu0 %v2949_v1 }
  0xeb   :  { %2714 = vmatpush3.bf16.msra.mxu0 %v3143_v44 }
  0xec   :  { %2721 = vmatprep.subr.bf16.mxu0 %v2949_v1 }
 0x1b9   :  { %v913_v50 = vpop.f32.mrb[0].mxu0 }
 0x1ba   :  { %v2757_v51 = vadd.f32 %v3160_v47, %v913_v50  ;;  %v2400_v52 = vpop.f32.mrb[1].mxu0  ;;  %v400_v50 = vld [vmem:[#allocation6 + $0x1e8] sm:$0xff] }
 0x1bb   :  { %v401_v52 = vld [vmem:[#allocation6 + $0x1f0] sm:$0xff] }
 0x1bc   :  { %v918_v53 = vmul.f32 %v2757_v51, %v3162_v49  ;;  %v2596_v51 = vpack.c.bf16 %v400_v50, %v399_v48 }
 0x1be   :  { %2794 = vtanh.f32 %v918_v53  ;;  %v402_v53 = vld [vmem:[#allocation6 + $0x1f8] sm:$0xff]  ;;  %2597 = vmatpush3.bf16.msra.mxu1 %v2596_v51 }
 0x1bf   :  { %2598 = vmatprep.subr.bf16.mxu1 %v2949_v1 }
 0x1c8   :  { %v2795_v54 = vpop.eup %2794 }
 0x1c9   :  { %v920_v56 = vmul.f32 %v2795_v54, %v3162_v49  ;;  %v2599_v54 = vpack.c.bf16 %v402_v53, %v401_v52 }
 0x1cb   :  { %v3170_v57 = vadd.f32 %v920_v56, %v3166_v55  ;;  %v567_v56 = vld [vmem:[#allocation6 + $0x280] sm:$0xff]  ;;  %2600 = vmatpush3.bf16.msra.mxu1 %v2599_v54 }
 0x1cc   :  { %2625 = vmatprep.subr.bf16.mxu1 %v2949_v1 }
 0x1cd   :  { %924 = vrot.lane.b32.xlu0 %v3170_v57, %s2953_s2  ;;  %v922_v13 = vmul.f32 0.0, %v3170_v57 }
 0x1ce   :  { %2248 = vmatmul.mubr.f32.vlgmr.msra.gmra.mrb[2].mxu1 %v3103_v29 }
 0x1cf   :  { %2317 = vmatprep.mubr.msk.f32.mxu1 %vm2950_vm0, %v2951_v2 }
 0x23f   :  { %v925_v58 = vpop.permute.xlu0 %924 }
 0x240   :  { %v927_v59 = vmul.f32 %v925_v58, %v3170_v57  ;;  %v568_v58 = vld [vmem:[#allocation6 + $0x288] sm:$0xff] }
 0x242   :  { %929 = vrot.lane.b32.xlu0 %v927_v59, %s2954_s29  ;;  %v2626_v59 = vpack.c.bf16 %v568_v58, %v567_v56 }
 0x244   :  { %2627 = vmatpush3.bf16.msra.mxu1 %v2626_v59 }
 0x245   :  { %2628 = vmatprep.subr.bf16.mxu1 %v2949_v1 }
 0x248   :  { %2630 = vmatpush3.bf16.msra.mxu1 %v2629_v62 }
 0x249   :  { %2631 = vmatprep.subr.bf16.mxu1 %v2949_v1 }
 0x24c   :  { %2633 = vmatpush3.bf16.msra.mxu1 %v2632_v3 }
 0x24d   :  { %2634 = vmatprep.subr.bf16.mxu1 %v2949_v1 }
 0x250   :  { %2636 = vmatpush3.bf16.msra.mxu1 %v2635_v6 }
 0x251   :  { %2637 = vmatprep.subr.bf16.mxu1 %v2949_v1 }
 0x254   :  { %2639 = vmatpush3.bf16.msra.mxu1 %v2638_v9 }
 0x255   :  { %2640 = vmatprep.subr.bf16.mxu1 %v2949_v1 }
 0x258   :  { %2642 = vmatpush3.bf16.msra.mxu1 %v2641_v12 }
 0x259   :  { %2643 = vmatprep.subr.bf16.mxu1 %v2949_v1 }
 0x2b4   :  { %v930_v14 = vpop.permute.xlu0 %929 }
 0x2b5   :  { %v3182_v17 = vadd.f32 %v930_v14, %v922_v13  ;;  %v579_v13 = vld [vmem:[#allocation6 + $0x2e0] sm:$0xff]  ;;  %v580_v14 = vld [vmem:[#allocation6 + $0x2e8] sm:$0xff] }
 0x2b6   :  { %v2644_v15 = vpack.c.bf16 %v580_v14, %v579_v13 }
 0x2b7   :  { %2796 = vtanh.f32 %v3182_v17 }
 0x2b8   :  { %2645 = vmatpush3.bf16.msra.mxu1 %v2644_v15 }
 0x2b9   :  { %2646 = vmatprep.subr.bf16.mxu1 %v2949_v1 }
 0x2bc   :  { %2648 = vmatpush3.bf16.msra.mxu1 %v2647_v19 }
 0x2bd   :  { %2673 = vmatprep.subr.bf16.mxu1 %v2949_v1 }
 0x2bf   :  { %2318 = vmatmul.mubr.f32.vlgmr.msra.gmra.mrb[4].mxu1 %v3103_v29 }
 0x2c0   :  { %2675 = vmatpush3.bf16.msra.mxu1 %v2674_v22  ;;  %2387 = vmatprep.mubr.msk.f32.mxu1 %vm2950_vm0, %v2951_v2 }
 0x2c1   :  { %v2797_v31 = vpop.eup %2796  ;;  %2676 = vmatprep.subr.bf16.mxu1 %v2949_v1 }
 0x2c2   :  { %935 = vrot.lane.b32.xlu1 %v2797_v31, %s2953_s2  ;;  %v754_v31 = vld [vmem:[#allocation6 + $0x3b8] sm:$0xff] }
 0x2c3   :  { %v2683_v32 = vpack.c.bf16 %v754_v31, %v753_v30 }
 0x2c4   :  { %2678 = vmatpush3.bf16.msra.mxu1 %v2677_v25 }
 0x2c5   :  { %2679 = vmatprep.subr.bf16.mxu1 %v2949_v1 }
 0x2c8   :  { %2681 = vmatpush3.bf16.msra.mxu1 %v2680_v28 }
 0x2c9   :  { %2682 = vmatprep.subr.bf16.mxu1 %v2949_v1 }
 0x2cc   :  { %2684 = vmatpush3.bf16.msra.mxu1 %v2683_v32 }
 0x2cd   :  { %2685 = vmatprep.subr.bf16.mxu1 %v2949_v1 }
 0x2d0   :  { %2687 = vmatpush3.bf16.msra.mxu1 %v2686_v35 }
 0x2d1   :  { %2688 = vmatprep.subr.bf16.mxu1 %v2949_v1 }
 0x2d4   :  { %2690 = vmatpush3.bf16.msra.mxu1 %v2689_v38 }
 0x2d5   :  { %2691 = vmatprep.subr.bf16.mxu1 %v2949_v1 }
 0x2d8   :  { %2693 = vmatpush3.bf16.msra.mxu1 %v2692_v42 }
 0x2d9   :  { %2694 = vmatprep.subr.bf16.mxu1 %v2949_v1 }
 0x2dc   :  { %2696 = vmatpush3.bf16.msra.mxu1 %v2695_v46 }
 0x2dd   :  { %2703 = vmatprep.subr.bf16.mxu1 %v2949_v1 }
 0x2df   :  { %2388 = vmatmul.mubr.f32.vlgmr.msra.gmra.mrb[6].mxu1 %v3103_v29 }
 0x2e0   :  { %2705 = vmatpush3.bf16.msra.mxu1 %v3138_v41  ;;  %2409 = vmatprep.mubr.msk.f32.mxu1 %vm2950_vm0, %v2951_v2 }
 0x2e1   :  { %2706 = vmatprep.subr.bf16.mxu1 %v2949_v1 }
 0x2e4   :  { %2708 = vmatpush3.bf16.msra.mxu1 %v3143_v44 }
 0x2e5   :  { %2715 = vmatprep.subr.bf16.mxu1 %v2949_v1 }
 0x334   :  { %v936_v48 = vpop.permute.xlu1 %935 }
 0x335   :  { %v938_v50 = vmul.f32 %v936_v48, %v3170_v57 }
 0x337   :  { %941 = vrot.lane.b32.xlu1 %v938_v50, %s2954_s29 }
 0x3a9   :  { %v942_v51 = vpop.permute.xlu1 %941 }
 0x3aa   :  { %2410 = vmatmul.mubr.msk.f32.vlgmr.msra.gmra.mrb[0].mxu1 %vm843_vm4, %v942_v51 }
 0x3ab   :  { %2717 = vmatpush3.bf16.msra.mxu1 %v3138_v41  ;;  %2431 = vmatprep.mubr.msk.f32.mxu1 %vm2950_vm0, %v2951_v2 }
 0x3ac   :  { %2718 = vmatprep.subr.bf16.mxu1 %v2949_v1 }
 0x3af   :  { %2720 = vmatpush3.bf16.msra.mxu1 %v3143_v44 }
 0x3b0   :  { %2727 = vmatprep.subr.bf16.mxu1 %v2949_v1 }
 0x47d   :  { %v1011_v29 = vpop.f32.mrb[0].mxu1 }
 0x47e   :  { %v2758_v57 = vadd.f32 %v3160_v47, %v1011_v29  ;;  %v2411_v52 = vpop.f32.mrb[1].mxu1 }
 0x480   :  { %v1016_v53 = vmul.f32 %v2758_v57, %v3162_v49 }
 0x482   :  { %2798 = vtanh.f32 %v1016_v53 }
 0x48c   :  { %v2799_v54 = vpop.eup %2798 }
 0x48d   :  { %v1018_v56 = vmul.f32 %v2799_v54, %v3162_v49 }
 0x48f   :  { %v1019_v58 = vadd.f32 %v1018_v56, %v3166_v55 }
 0x491   :  { %1022 = vrot.lane.b32.xlu0 %v1019_v58, %s2953_s2  ;;  %v1020_v61 = vmul.f32 %v1019_v58, %v3182_v17 }
 0x503   :  { %v1023_v59 = vpop.permute.xlu0 %1022 }
 0x504   :  { %v1025_v60 = vmul.f32 %v1023_v59, %v1019_v58 }
 0x506   :  { %1027 = vrot.lane.b32.xlu1 %v1025_v60, %s2954_s29 }
 0x578   :  { %v1028_v62 = vpop.permute.xlu1 %1027 }
 0x579   :  { %v1030_v63 = vadd.f32 %v1028_v62, %v1020_v61 }
 0x57b   :  { %2800 = vtanh.f32 %v1030_v63 }
 0x585   :  { %v2801_v0 = vpop.eup %2800 }
 0x586   :  { %1033 = vrot.lane.b32.xlu0 %v2801_v0, %s2953_s2 }
 0x5f8   :  { %v1034_v3 = vpop.permute.xlu0 %1033 }
 0x5f9   :  { %v1036_v4 = vmul.f32 %v1034_v3, %v1019_v58 }
 0x5fb   :  { %1039 = vrot.lane.b32.xlu1 %v1036_v4, %s2954_s29 }
 0x66d   :  { %v1040_v5 = vpop.permute.xlu1 %1039 }
 0x66e   :  { %2421 = vmatmul.mubr.msk.f32.vlgmr.msra.gmra.mrb[2].mxu0 %vm843_vm4, %v1040_v5 }
 0x66f   :  { %2723 = vmatpush3.bf16.msra.mxu0 %v3138_v41  ;;  %2442 = vmatprep.mubr.msk.f32.mxu0 %vm2950_vm0, %v2951_v2 }
 0x670   :  { %2724 = vmatprep.subr.bf16.mxu0 %v2949_v1 }
 0x673   :  { %2726 = vmatpush3.bf16.msra.mxu0 %v3143_v44 }
 0x674   :  { %2733 = vmatprep.subr.bf16.mxu0 %v2949_v1 }
 0x741   :  { %v1109_v17 = vpop.f32.mrb[2].mxu0 }
 0x742   :  { %v2759_v6 = vadd.f32 %v3160_v47, %v1109_v17  ;;  %v2422_v7 = vpop.f32.mrb[3].mxu0 }
 0x744   :  { %v1114_v8 = vmul.f32 %v2759_v6, %v3162_v49 }
 0x746   :  { %2802 = vtanh.f32 %v1114_v8 }
 0x750   :  { %v2803_v9 = vpop.eup %2802 }
 0x751   :  { %v1116_v10 = vmul.f32 %v2803_v9, %v3162_v49 }
 0x753   :  { %v1117_v11 = vadd.f32 %v1116_v10, %v3166_v55 }
 0x755   :  { %1120 = vrot.lane.b32.xlu0 %v1117_v11, %s2953_s2  ;;  %v1118_v14 = vmul.f32 %v1117_v11, %v1030_v63 }
 0x7c7   :  { %v1121_v12 = vpop.permute.xlu0 %1120 }
 0x7c8   :  { %v1123_v13 = vmul.f32 %v1121_v12, %v1117_v11 }
 0x7ca   :  { %1125 = vrot.lane.b32.xlu1 %v1123_v13, %s2954_s29 }
 0x83c   :  { %v1126_v15 = vpop.permute.xlu1 %1125 }
 0x83d   :  { %v1128_v16 = vadd.f32 %v1126_v15, %v1118_v14 }
 0x83f   :  { %2804 = vtanh.f32 %v1128_v16 }
 0x849   :  { %v2805_v18 = vpop.eup %2804 }
 0x84a   :  { %1131 = vrot.lane.b32.xlu0 %v2805_v18, %s2953_s2 }
 0x8bc   :  { %v1132_v19 = vpop.permute.xlu0 %1131 }
 0x8bd   :  { %v1134_v20 = vmul.f32 %v1132_v19, %v1117_v11 }
 0x8bf   :  { %1137 = vrot.lane.b32.xlu1 %v1134_v20, %s2954_s29 }
 0x931   :  { %v1138_v21 = vpop.permute.xlu1 %1137 }
 0x932   :  { %2432 = vmatmul.mubr.msk.f32.vlgmr.msra.gmra.mrb[2].mxu1 %vm843_vm4, %v1138_v21 }
 0x933   :  { %2729 = vmatpush3.bf16.msra.mxu1 %v3138_v41  ;;  %2453 = vmatprep.mubr.msk.f32.mxu1 %vm2950_vm0, %v2951_v2 }
 0x934   :  { %2730 = vmatprep.subr.bf16.mxu1 %v2949_v1 }
 0x937   :  { %2732 = vmatpush3.bf16.msra.mxu1 %v3143_v44 }
 0x938   :  { %2739 = vmatprep.subr.bf16.mxu1 %v2949_v1 }
 0xa05   :  { %v1207_v22 = vpop.f32.mrb[2].mxu1 }
 0xa06   :  { %v2760_v23 = vadd.f32 %v3160_v47, %v1207_v22  ;;  %v2433_v24 = vpop.f32.mrb[3].mxu1 }
 0xa08   :  { %v1212_v25 = vmul.f32 %v2760_v23, %v3162_v49 }
 0xa0a   :  { %2806 = vtanh.f32 %v1212_v25 }
 0xa14   :  { %v2807_v26 = vpop.eup %2806 }
 0xa15   :  { %v1214_v27 = vmul.f32 %v2807_v26, %v3162_v49 }
 0xa17   :  { %v1215_v28 = vadd.f32 %v1214_v27, %v3166_v55 }
 0xa19   :  { %1218 = vrot.lane.b32.xlu0 %v1215_v28, %s2953_s2  ;;  %v1216_v32 = vmul.f32 %v1215_v28, %v1128_v16 }
 0xa8b   :  { %v1219_v30 = vpop.permute.xlu0 %1218 }
 0xa8c   :  { %v1221_v31 = vmul.f32 %v1219_v30, %v1215_v28 }
 0xa8e   :  { %1223 = vrot.lane.b32.xlu1 %v1221_v31, %s2954_s29 }
 0xb00   :  { %v1224_v33 = vpop.permute.xlu1 %1223 }
 0xb01   :  { %v1226_v34 = vadd.f32 %v1224_v33, %v1216_v32 }
 0xb03   :  { %2808 = vtanh.f32 %v1226_v34 }
 0xb0d   :  { %v2809_v35 = vpop.eup %2808 }
 0xb0e   :  { %1229 = vrot.lane.b32.xlu0 %v2809_v35, %s2953_s2 }
 0xb80   :  { %v1230_v36 = vpop.permute.xlu0 %1229 }
 0xb81   :  { %v1232_v37 = vmul.f32 %v1230_v36, %v1215_v28 }
 0xb83   :  { %1235 = vrot.lane.b32.xlu1 %v1232_v37, %s2954_s29 }
 0xbf5   :  { %v1236_v38 = vpop.permute.xlu1 %1235 }
 0xbf6   :  { %2443 = vmatmul.mubr.msk.f32.vlgmr.msra.gmra.mrb[4].mxu0 %vm843_vm4, %v1236_v38 }
 0xbf7   :  { %2735 = vmatpush3.bf16.msra.mxu0 %v3138_v41  ;;  %2464 = vmatprep.mubr.msk.f32.mxu0 %vm2950_vm0, %v2951_v2 }
 0xbf8   :  { %2736 = vmatprep.subr.bf16.mxu0 %v2949_v1 }
 0xbfb   :  { %2738 = vmatpush3.bf16.msra.mxu0 %v3143_v44 }
 0xbfc   :  { %2745 = vmatprep.subr.bf16.mxu0 %v2949_v1 }
 0xcc9   :  { %v1305_v39 = vpop.f32.mrb[4].mxu0 }
 0xcca   :  { %v2761_v40 = vadd.f32 %v3160_v47, %v1305_v39  ;;  %v2444_v42 = vpop.f32.mrb[5].mxu0 }
 0xccb   :  { %v1626_v42 = vld [vmem:[%s3356_s4] sm:$0x3f] }
 0xccc   :  { %v1310_v43 = vmul.f32 %v2761_v40, %v3162_v49  ;;  %v1628_v40 = vld [vmem:[#allocation9 + $0x8] sm:$0xff] }
 0xcce   :  { %2810 = vtanh.f32 %v1310_v43  ;;  %v1630_v43 = vld [vmem:[#allocation9 + $0x18] sm:$0xff] }
 0xcd8   :  { %v2811_v45 = vpop.eup %2810 }
 0xcd9   :  { %v1312_v46 = vmul.f32 %v2811_v45, %v3162_v49  ;;  %v1625_v45 = vld [vmem:[#allocation4] sm:$0xff] }
 0xcdb   :  { %v1313_v48 = vadd.f32 %v1312_v46, %v3166_v55 }
 0xcdd   :  { %1316 = vrot.lane.b32.xlu0 %v1313_v48, %s2953_s2  ;;  %v1314_v29 = vmul.f32 %v1313_v48, %v1226_v34 }
 0xd4f   :  { %v1317_v50 = vpop.permute.xlu0 %1316 }
 0xd50   :  { %v1319_v51 = vmul.f32 %v1317_v50, %v1313_v48 }
 0xd52   :  { %1321 = vrot.lane.b32.xlu1 %v1319_v51, %s2954_s29 }
 0xdc4   :  { %v1322_v57 = vpop.permute.xlu1 %1321 }
 0xdc5   :  { %v1324_v52 = vadd.f32 %v1322_v57, %v1314_v29 }
 0xdc7   :  { %2812 = vtanh.f32 %v1324_v52 }
 0xdd1   :  { %v2813_v53 = vpop.eup %2812 }
 0xdd2   :  { %1327 = vrot.lane.b32.xlu0 %v2813_v53, %s2953_s2  ;;  %v1793_v53 = vld [vmem:[#allocation11] sm:$0xff] }
 0xe44   :  { %v1328_v54 = vpop.permute.xlu0 %1327 }
 0xe45   :  { %v1330_v56 = vmul.f32 %v1328_v54, %v1313_v48  ;;  %v1794_v54 = vld [vmem:[#allocation11 + $0x8] sm:$0xff] }
 0xe47   :  { %1333 = vrot.lane.b32.xlu1 %v1330_v56, %s2954_s29  ;;  %v2752_v56 = vpack.c.bf16 %v1794_v54, %v1793_v53 }
 0xeb9   :  { %v1334_v58 = vpop.permute.xlu1 %1333 }
 0xeba   :  { %2454 = vmatmul.mubr.msk.f32.vlgmr.msra.gmra.mrb[4].mxu1 %vm843_vm4, %v1334_v58  ;;  %v1796_v58 = vld [vmem:[#allocation11 + $0x18] sm:$0xff] }
 0xebb   :  { %2741 = vmatpush3.bf16.msra.mxu1 %v3138_v41  ;;  %2475 = vmatprep.mubr.msk.f32.mxu1 %vm2950_vm0, %v2951_v2 }
 0xebc   :  { %2742 = vmatprep.subr.bf16.mxu1 %v2949_v1 }
 0xebf   :  { %2744 = vmatpush3.bf16.msra.mxu1 %v3143_v44 }
 0xec0   :  { %2489 = vmatprep.subr.mxu1 %v2951_v2 }
 0xf8d   :  { %v1403_v59 = vpop.f32.mrb[4].mxu1 }
 0xf8e   :  { %v2762_v60 = vadd.f32 %v3160_v47, %v1403_v59  ;;  %v2455_v61 = vpop.f32.mrb[5].mxu1 }
 0xf8f   :  { %v1917_v61 = vld [vmem:[%s3358_s6] ss:$0 sm:$0xff] }
 0xf90   :  { %v1408_v62 = vmul.f32 %v2762_v60, %v3162_v49 }
 0xf92   :  { %2814 = vtanh.f32 %v1408_v62 }
 0xf9c   :  { %v2815_v63 = vpop.eup %2814 }
 0xf9d   :  { %v1410_v0 = vmul.f32 %v2815_v63, %v3162_v49 }
 0xf9f   :  { %v1411_v41 = vadd.f32 %v1410_v0, %v3166_v55 }
 0xfa1   :  { %1414 = vrot.lane.b32.xlu0 %v1411_v41, %s2953_s2  ;;  %v1412_v44 = vmul.f32 %v1411_v41, %v1324_v52 }
0x1013   :  { %v1415_v3 = vpop.permute.xlu0 %1414 }
0x1014   :  { %v1417_v4 = vmul.f32 %v1415_v3, %v1411_v41  ;;  %v1918_v3 = vld [vmem:[%s3360_s8] ss:$0 sm:$0xff] }
0x1016   :  { %1419 = vrot.lane.b32.xlu1 %v1417_v4, %s2954_s29 }
0x1088   :  { %v1420_v5 = vpop.permute.xlu1 %1419 }
0x1089   :  { %v1422_v17 = vadd.f32 %v1420_v5, %v1412_v44  ;;  %v1920_v5 = vld [vmem:[%s3361_s9] ss:$0 sm:$0xff] }
0x108b   :  { %2816 = vtanh.f32 %v1422_v17 }
0x1095   :  { %v2817_v6 = vpop.eup %2816 }
0x1096   :  { %1425 = vrot.lane.b32.xlu0 %v2817_v6, %s2953_s2 }
0x1108   :  { %v1426_v7 = vpop.permute.xlu0 %1425 }
0x1109   :  { %v1428_v8 = vmul.f32 %v1426_v7, %v1411_v41 }
0x110b   :  { %1431 = vrot.lane.b32.xlu1 %v1428_v8, %s2954_s29  ;;  %v1921_v8 = vld [vmem:[#allocation3] ss:$0 sm:$0xff] }
0x117d   :  { %v1432_v9 = vpop.permute.xlu1 %1431 }
0x117e   :  { %2465 = vmatmul.mubr.msk.f32.vlgmr.msra.gmra.mrb[6].mxu0 %vm843_vm4, %v1432_v9 }
0x117f   :  { %2486 = vmatprep.mubr.msk.f32.mxu0 %vm2950_vm0, %v2951_v2 }
0x1251   :  { %v1501_v10 = vpop.f32.mrb[6].mxu0 }
0x1252   :  { %v2763_v11 = vadd.f32 %v3160_v47, %v1501_v10  ;;  %v2466_v12 = vpop.f32.mrb[7].mxu0 }
0x1254   :  { %v1506_v13 = vmul.f32 %v2763_v11, %v3162_v49 }
0x1256   :  { %2818 = vtanh.f32 %v1506_v13 }
0x1260   :  { %v2819_v14 = vpop.eup %2818 }
0x1261   :  { %v1508_v15 = vmul.f32 %v2819_v14, %v3162_v49 }
0x1263   :  { %v1509_v16 = vadd.f32 %v1508_v15, %v3166_v55 }
0x1265   :  { %1512 = vrot.lane.b32.xlu0 %v1509_v16, %s2953_s2  ;;  %v1510_v20 = vmul.f32 %v1509_v16, %v1422_v17 }
0x12d7   :  { %v1513_v18 = vpop.permute.xlu0 %1512 }
0x12d8   :  { %v1515_v19 = vmul.f32 %v1513_v18, %v1509_v16 }
0x12da   :  { %1517 = vrot.lane.b32.xlu1 %v1515_v19, %s2954_s29 }
0x134c   :  { %v1518_v21 = vpop.permute.xlu1 %1517 }
0x134d   :  { %v1520_v22 = vadd.f32 %v1518_v21, %v1510_v20 }
0x134f   :  { %2820 = vtanh.f32 %v1520_v22 }
0x1359   :  { %v2821_v23 = vpop.eup %2820 }
0x135a   :  { %1523 = vrot.lane.b32.xlu0 %v2821_v23, %s2953_s2 }
0x13cc   :  { %v1524_v24 = vpop.permute.xlu0 %1523 }
0x13cd   :  { %v1526_v25 = vmul.f32 %v1524_v24, %v1509_v16 }
0x13cf   :  { %1529 = vrot.lane.b32.xlu1 %v1526_v25, %s2954_s29 }
0x1441   :  { %v1530_v26 = vpop.permute.xlu1 %1529 }
0x1442   :  { %2476 = vmatmul.mubr.msk.f32.vlgmr.msra.gmra.mrb[6].mxu1 %vm843_vm4, %v1530_v26 }
0x1443   :  { %2491 = vmatprep.mubr.msk.f32.mxu1 %vm2950_vm0, %v2951_v2  ;;  %2490 = vmatpush3.msk.msra.mxu1 %vm1710_vm5, %v1626_v42 }
0x1444   :  { %2751 = vmatprep.subr.bf16.mxu1 %v2949_v1 }
0x1446   :  { %2492 = vmatmul.mubr.msk.f32.vlgmr.msra.gmra.mrb[8].mxu1 %vm1706_vm6, %v1625_v45 }
0x1447   :  { %2502 = vmatprep.mubr.msk.f32.mxu1 %vm2950_vm0, %v2951_v2  ;;  %2753 = vmatpush3.bf16.msra.mxu1 %v2752_v56  ;;  %v1795_v2 = vld [vmem:[#allocation11 + $0x10] sm:$0xff] }
0x1448   :  { %2754 = vmatprep.subr.bf16.mxu1 %v2949_v1  ;;  %v2755_v59 = vpack.c.bf16 %v1796_v58, %v1795_v2 }
0x144b   :  { %2756 = vmatpush3.bf16.msra.mxu1 %v2755_v59 }
0x1515   :  { %v1599_v27 = vpop.f32.mrb[6].mxu1 }
0x1516   :  { %v2764_v28 = vadd.f32 %v3160_v47, %v1599_v27  ;;  %v2477_v30 = vpop.f32.mrb[7].mxu1  ;;  %v1627_v47 = vld [vmem:[#allocation9] sm:$0xff] }
0x1518   :  { %v1604_v31 = vmul.f32 %v2764_v28, %v3162_v49 }
0x1519   :  { %v1780_v29 = vpop.f32.mrb[8].mxu1 }
0x151a   :  { %2822 = vtanh.f32 %v1604_v31  ;;  %v2493_v57 = vpop.f32.mrb[9].mxu1 }
0x1524   :  { %v2823_v32 = vpop.eup %2822 }
0x1525   :  { %v1606_v33 = vmul.f32 %v2823_v32, %v3162_v49  ;;  %v2746_v49 = vpack.c.bf16 %v1628_v40, %v1627_v47 }
0x1527   :  { %v1607_v34 = vadd.f32 %v1606_v33, %v3166_v55  ;;  %v1629_v55 = vld [vmem:[#allocation9 + $0x10] sm:$0xff]  ;;  %2747 = vmatpush3.bf16.msra.mxu0 %v2746_v49 }
0x1528   :  { %v2749_v46 = vpack.c.bf16 %v1630_v43, %v1629_v55  ;;  %2748 = vmatprep.subr.bf16.mxu0 %v2949_v1 }
0x1529   :  { %1610 = vrot.lane.b32.xlu0 %v1607_v34, %s2953_s2  ;;  %v1608_v37 = vmul.f32 %v1607_v34, %v1520_v22 }
0x152b   :  { %2750 = vmatpush3.bf16.msra.mxu0 %v2749_v46 }
0x159b   :  { %v1611_v35 = vpop.permute.xlu0 %1610 }
0x159c   :  { %v1613_v36 = vmul.f32 %v1611_v35, %v1607_v34 }
0x159e   :  { %1615 = vrot.lane.b32.xlu1 %v1613_v36, %s2954_s29 }
0x1610   :  { %v1616_v38 = vpop.permute.xlu1 %1615 }
0x1611   :  { %v1618_v39 = vadd.f32 %v1616_v38, %v1608_v37 }
0x1613   :  { %2824 = vtanh.f32 %v1618_v39 }
0x161d   :  { %v2825_v48 = vpop.eup %2824 }
0x161e   :  { %1621 = vrot.lane.b32.xlu0 %v2825_v48, %s2953_s2 }
0x1690   :  { %v1622_v50 = vpop.permute.xlu0 %1621 }
0x1691   :  { %v1624_v51 = vmul.f32 %v1622_v50, %v1607_v34 }
0x1693   :  { %1632 = vrot.lane.b32.xlu1 %v1624_v51, %s2954_s29 }
0x1705   :  { %v1633_v52 = vpop.permute.xlu1 %1632 }
0x1706   :  { %2487 = vmatmul.mubr.msk.f32.vlgmr.msra.gmra.mrb[8].mxu0 %vm843_vm4, %v1633_v52 }
0x17d9   :  { %v1702_v60 = vpop.f32.mrb[8].mxu0 }
0x17da   :  { %v1781_v62 = vadd.f32 %v1780_v29, %v1702_v60  ;;  %v2488_v63 = vpop.f32.mrb[9].mxu0 }
0x17dc   :  { %v1791_v0 = vadd.f32 %v1917_v61, %v1781_v62 }
0x17de   :  { %v1792_v41 = vmax.f32 %v1791_v0, 0.0 }
0x17e0   :  { %2503 = vmatmul.mubr.msk.f32.vlgmr.msra.gmra.mrb[10].mxu1 %vm843_vm4, %v1792_v41 }
0x18b3   :  { %v1873_v1 = vpop.f32.mrb[10].mxu1 }
0x18b4   :  { %v1874_v4 = vadd.f32 %v1918_v3, %v1873_v1  ;;  %v2504_v44 = vpop.f32.mrb[11].mxu1 }
0x18b6   :  { %v1877_v17 = vmax.f32 %v1874_v4, 0.0 }
0x18b8   :  { %v1885_v6 = vmul.f32 %v1920_v5, %v1877_v17 }
0x18ba   :  { %v1886_v7 = vsel %vm843_vm4, %v1885_v6, 0.0 }
0x18bb   :  { %1887 = vadd.xlane.f32.xlu0 %v1886_v7 }
0x1948   :  { %v1888_v9 = vpop.xlane.xlu0 %1887 }
0x1949   :  { %v1896_v10 = vadd.f32 %v1921_v8, %v1888_v9 }
0x194b   :  { %1898 = vst.msk [vmem:[%s3363_s11] sm:$0xff] %vm1897_vm7, %v1896_v10 }
0x194c   :  { %1903 = vsyncpa [#allocation5], 1 }
0x194d   :  { %1904 = vsyncpa [#allocation7], 1 }
0x194e   :  { %1905 = vsyncpa [#allocation10], 1 }

</bundles_post_ra>
